<compile_context>
chip_gen: v7x
topology: tpu7x:2x2x1
jax: 0.10.0
libtpu: 0.0.40
codegen_flags: <defaults>
</compile_context>

<pallas_src>
import jax
import jax.numpy as jnp
from jax import lax
from jax.experimental import pallas as pl
from jax.experimental.pallas import tpu as pltpu


def _round_up(x, m):
    return (x + m - 1) // m * m


# ----------------------------------------------------------------------------
# Kernel: one invocation runs all T decode steps.
#   Phase 0: gather embedding rows for all steps        (off the recurrence)
#   Phase 1: batched x-path matmul gi = X @ W_ih + b    (off the recurrence)
#   Phase 2: sequential GRU recurrence (h-path only)
#   Phase 3: batched output projection, one lane-dense writeback
# ----------------------------------------------------------------------------
def decoder_seq_kernel(toks_ref,     # SMEM (T,)   int32   scalar-prefetched tokens
                       emb_ref,      # VMEM (V, EP)        embedding table (zero-padded cols)
                       h0_ref,       # VMEM (1, HP)        initial hidden (zero-padded)
                       wih_ref,      # VMEM (EP, 3*HP)     x-path GRU weights  [r | z | n]
                       bih_ref,      # VMEM (1, 3*HP)      [b_ih_r+b_hh_r | b_ih_z+b_hh_z | b_ih_n]
                       whh_ref,      # VMEM (HP, 3*HP)     h-path GRU weights  [r | z | n]
                       bhh_ref,      # VMEM (1, 3*HP)      [0 | 0 | b_hh_n]
                       wout_ref,     # VMEM (HP, VP)       output projection (transposed, padded)
                       bout_ref,     # VMEM (1, VP)
                       logits_ref,   # VMEM (T, VP)  out:  per-step logits
                       hout_ref,     # VMEM (1, HP)  out:  final hidden
                       x_sc,         # VMEM (T, EP)  scratch: gathered embeddings
                       gi_sc,        # VMEM (T, 3*HP) scratch: precomputed x-path gates
                       h_sc):        # VMEM (T, HP)  scratch: all hidden states
    T = logits_ref.shape[0]
    HP = h0_ref.shape[-1]
    unroll = T <= 32     # short fixed trip counts: give LLO scheduler visibility

    # --- Phase 0: embedding gather (dynamic row reads from the resident table)
    def gather(t, carry):
        x_sc[pl.ds(t, 1), :] = emb_ref[pl.ds(toks_ref[t], 1), :]
        return carry
    lax.fori_loop(0, T, gather, 0, unroll=unroll)

    # --- Phase 1: batched x-path gates for all T steps (M=T matmul)
    gi_sc[...] = (jnp.dot(x_sc[...], wih_ref[...],
                          preferred_element_type=jnp.float32) + bih_ref[...])

    # --- Phase 2: sequential recurrence; only the h-path matmul is serial
    def step(t, h):                                   # h: (1, HP) f32 carry
        gh = (jnp.dot(h, whh_ref[...],
                      preferred_element_type=jnp.float32) + bhh_ref[...])  # (1, 3*HP)
        gi_t = gi_sc[pl.ds(t, 1), :]                                       # (1, 3*HP)
        r = jax.nn.sigmoid(gi_t[:, 0 * HP:1 * HP] + gh[:, 0 * HP:1 * HP])
        z = jax.nn.sigmoid(gi_t[:, 1 * HP:2 * HP] + gh[:, 1 * HP:2 * HP])
        n = jnp.tanh(gi_t[:, 2 * HP:3 * HP] + r * gh[:, 2 * HP:3 * HP])
        h_new = n + z * (h - n)                       # == (1-z)*n + z*h
        h_sc[pl.ds(t, 1), :] = h_new
        return h_new
    h_final = lax.fori_loop(0, T, step, h0_ref[...], unroll=unroll)

    # --- Phase 3: batched output projection, single lane-dense writeback
    logits_ref[...] = (jnp.dot(h_sc[...], wout_ref[...],
                               preferred_element_type=jnp.float32) + bout_ref[...])
    hout_ref[...] = h_final


# ----------------------------------------------------------------------------
# Parameter construction (PyTorch-module shapes) and packing for the kernel.
# ----------------------------------------------------------------------------
def make_raw_params(key, hidden_size, output_size, n_classes):
    H = hidden_size + n_classes
    E = hidden_size
    V = output_size
    ks = jax.random.split(key, 7)
    scale = 1.0 / jnp.sqrt(jnp.float32(H))

    emb = jax.random.normal(ks[0], (V, E), jnp.float32)
    w_ih = jax.random.uniform(ks[1], (3 * H, E), jnp.float32, -scale, scale)
    w_hh = jax.random.uniform(ks[2], (3 * H, H), jnp.float32, -scale, scale)
    b_ih = jax.random.uniform(ks[3], (3 * H,), jnp.float32, -scale, scale)
    b_hh = jax.random.uniform(ks[4], (3 * H,), jnp.float32, -scale, scale)
    w_out = jax.random.uniform(ks[5], (V, H), jnp.float32, -scale, scale)
    b_out = jax.random.uniform(ks[6], (V,), jnp.float32, -scale, scale)
    return dict(emb=emb, w_ih=w_ih, w_hh=w_hh, b_ih=b_ih, b_hh=b_hh,
                w_out=w_out, b_out=b_out, E=E, H=H, V=V)


def pack_params(raw):
    """Pad every lane dim to 128; pre-transpose; pre-sum r/z biases.

    Padded rows/cols of every weight are zero, which keeps the padded lanes
    of the carried hidden state exactly zero (invariant relied on in-kernel).
    """
    E, H, V = raw["E"], raw["H"], raw["V"]
    EP, HP, VP = _round_up(E, 128), _round_up(H, 128), _round_up(V, 128)
    w_ih, w_hh = raw["w_ih"], raw["w_hh"]
    b_ih, b_hh = raw["b_ih"], raw["b_hh"]

    emb_p = jnp.zeros((V, EP), jnp.float32).at[:, :E].set(raw["emb"])

    # Gate chunks (each HP lanes): [r | z | n]
    wih = jnp.zeros((EP, 3 * HP), jnp.float32)
    whh = jnp.zeros((HP, 3 * HP), jnp.float32)
    for c in range(3):
        wih = wih.at[:E, c * HP:c * HP + H].set(w_ih[c * H:(c + 1) * H, :].T)
        whh = whh.at[:H, c * HP:c * HP + H].set(w_hh[c * H:(c + 1) * H, :].T)

    bih = jnp.zeros((1, 3 * HP), jnp.float32)
    bih = bih.at[0, 0 * HP:0 * HP + H].set(b_ih[0:H] + b_hh[0:H])            # r (pre-summed)
    bih = bih.at[0, 1 * HP:1 * HP + H].set(b_ih[H:2 * H] + b_hh[H:2 * H])    # z (pre-summed)
    bih = bih.at[0, 2 * HP:2 * HP + H].set(b_ih[2 * H:3 * H])                # b_ih_n

    bhh = jnp.zeros((1, 3 * HP), jnp.float32)
    bhh = bhh.at[0, 2 * HP:2 * HP + H].set(b_hh[2 * H:3 * H])                # b_hh_n

    wout_p = jnp.zeros((HP, VP), jnp.float32).at[:H, :V].set(raw["w_out"].T)
    bout_p = jnp.zeros((1, VP), jnp.float32).at[0, :V].set(raw["b_out"])

    return dict(emb=emb_p, wih=wih, bih=bih, whh=whh, bhh=bhh,
                wout=wout_p, bout=bout_p,
                E=E, H=H, V=V, EP=EP, HP=HP, VP=VP)


# ----------------------------------------------------------------------------
# Wrappers
# ----------------------------------------------------------------------------
def decoder_decode(tokens, hidden, packed):
    """Teacher-forced multi-step decode in ONE pallas_call.

    tokens : (T,) int          input token for each step
    hidden : (1, 1, H) float32 initial GRU hidden
    returns (logits (T, V), hidden (1, 1, H))
    """
    H, V = packed["H"], packed["V"]
    EP, HP, VP = packed["EP"], packed["HP"], packed["VP"]

    # Clamp token ids (PyTorch embedding would raise; we clamp and document).
    toks = jnp.clip(jnp.asarray(tokens, jnp.int32).reshape(-1), 0, V - 1)
    T = int(toks.shape[0])

    h0 = jnp.zeros((1, HP), jnp.float32).at[:, :H].set(
        hidden.reshape(1, H).astype(jnp.float32))

    const = lambda i, toks: (0, 0)   # every array fully resident, constant index

    grid_spec = pltpu.PrefetchScalarGridSpec(
        num_scalar_prefetch=1,
        grid=(1,),                                   # all T steps inside the kernel
        in_specs=[
            pl.BlockSpec((V, EP), const),            # embedding table (resident)
            pl.BlockSpec((1, HP), const),            # initial hidden
            pl.BlockSpec((EP, 3 * HP), const),       # x-path GRU weights
            pl.BlockSpec((1, 3 * HP), const),
            pl.BlockSpec((HP, 3 * HP), const),       # h-path GRU weights
            pl.BlockSpec((1, 3 * HP), const),
            pl.BlockSpec((HP, VP), const),           # output projection
            pl.BlockSpec((1, VP), const),
        ],
        out_specs=(
            pl.BlockSpec((T, VP), const),            # all logits, one writeback
            pl.BlockSpec((1, HP), const),            # final hidden
        ),
        scratch_shapes=[
            pltpu.VMEM((T, EP), jnp.float32),        # gathered embeddings
            pltpu.VMEM((T, 3 * HP), jnp.float32),    # precomputed x-path gates
            pltpu.VMEM((T, HP), jnp.float32),        # all hidden states
        ],
    )

    logits_p, h_p = pl.pallas_call(
        decoder_seq_kernel,
        out_shape=(jax.ShapeDtypeStruct((T, VP), jnp.float32),
                   jax.ShapeDtypeStruct((1, HP), jnp.float32)),
        grid_spec=grid_spec,
        compiler_params=pltpu.CompilerParams(
            dimension_semantics=("arbitrary",)),     # recurrence is sequential
    )(toks, packed["emb"], h0, packed["wih"], packed["bih"],
      packed["whh"], packed["bhh"], packed["wout"], packed["bout"])

    logits = logits_p[:, :V]
    h_new = h_p[:, :H].reshape(1, 1, H)
    return logits, h_new


def decoder_forward(token, hidden, packed):
    """Single step — matches PyTorch Decoder.forward(input_tensor, hidden)."""
    logits, h_new = decoder_decode(jnp.asarray([token], jnp.int32), hidden, packed)
    return logits, h_new          # logits (1, V), hidden (1, 1, H)


# ----------------------------------------------------------------------------
# Pure-JAX reference (same PyTorch semantics) for verification.
# ----------------------------------------------------------------------------
def _gru_step_ref(x, h, raw):
    H = raw["H"]
    gi = x @ raw["w_ih"].T + raw["b_ih"]
    gh = h @ raw["w_hh"].T + raw["b_hh"]
    r = jax.nn.sigmoid(gi[:, :H] + gh[:, :H])
    z = jax.nn.sigmoid(gi[:, H:2 * H] + gh[:, H:2 * H])
    n = jnp.tanh(gi[:, 2 * H:] + r * gh[:, 2 * H:])
    return (1.0 - z) * n + z * h


def decoder_decode_ref(tokens, hidden, raw):
    H = raw["H"]
    h = hidden.reshape(1, H)
    logits = []
    for tok in list(jnp.asarray(tokens, jnp.int32)):
        x = raw["emb"][int(tok)][None, :]
        h = _gru_step_ref(x, h, raw)
        logits.append(h @ raw["w_out"].T + raw["b_out"])
    return jnp.concatenate(logits, axis=0), h.reshape(1, 1, H)


# ----------------------------------------------------------------------------
if __name__ == "__main__":
    # Small shapes consistent with the module (hidden_size=32 instead of 256).
    hidden_size = 32
    n_classes = 4
    output_size = 32          # vocab size (SOS/EOS + letters in the lab)
    latent_dim = 32           # unused in Decoder.forward, as in the reference

    key = jax.random.PRNGKey(0)
    pkey, hkey, tkey = jax.random.split(key, 3)
    raw = make_raw_params(pkey, hidden_size, output_size, n_classes)
    packed = pack_params(raw)

    H = hidden_size + n_classes
    hidden = jax.random.normal(hkey, (1, 1, H), jnp.float32)

    T = 8
    tokens = jax.random.randint(tkey, (T,), 0, output_size, jnp.int32)

    # Multi-step teacher-forced decode: single kernel launch, weights resident.
    logits_seq, h_seq = decoder_decode(tokens, hidden, packed)
    jax.block_until_ready((logits_seq, h_seq))

    # Single step (matches the PyTorch module forward signature).
    logits_1, h_1 = decoder_forward(int(tokens[0]), hidden, packed)
    jax.block_until_ready((logits_1, h_1))

    # Verify against pure-JAX reference.
    logits_ref, h_ref = decoder_decode_ref(tokens, hidden, raw)
    x0 = raw["emb"][int(tokens[0])][None, :]
    h1_ref = _gru_step_ref(x0, hidden.reshape(1, H), raw)
    logits1_ref = h1_ref @ raw["w_out"].T + raw["b_out"]

    assert logits_seq.shape == (T, output_size)
    assert h_seq.shape == (1, 1, H)
    assert jnp.allclose(logits_seq, logits_ref, atol=1e-4, rtol=1e-4)
    assert jnp.allclose(h_seq, h_ref, atol=1e-4, rtol=1e-4)

    assert logits_1.shape == (1, output_size)
    assert h_1.shape == (1, 1, H)
    assert jnp.allclose(logits_1, logits1_ref, atol=1e-4, rtol=1e-4)
    assert jnp.allclose(h_1.reshape(1, H), h1_ref, atol=1e-4, rtol=1e-4)

    print("KERNEL_OK")
</pallas_src>

<mosaic_0001>
module attributes {stable_mosaic.version = 11 : i64} {
  func.func @decoder_seq_kernel(%arg0: i32, %arg1: memref<8xi32, #tpu.memory_space<smem>>, %arg2: memref<32x128xf32, #tpu.memory_space<vmem>>, %arg3: memref<1x128xf32, #tpu.memory_space<vmem>>, %arg4: memref<128x384xf32, #tpu.memory_space<vmem>>, %arg5: memref<1x384xf32, #tpu.memory_space<vmem>>, %arg6: memref<128x384xf32, #tpu.memory_space<vmem>>, %arg7: memref<1x384xf32, #tpu.memory_space<vmem>>, %arg8: memref<128x128xf32, #tpu.memory_space<vmem>>, %arg9: memref<1x128xf32, #tpu.memory_space<vmem>>, %arg10: memref<8x128xf32, #tpu.memory_space<vmem>>, %arg11: memref<1x128xf32, #tpu.memory_space<vmem>>, %arg12: memref<8x128xf32, #tpu.memory_space<vmem>>, %arg13: memref<8x384xf32, #tpu.memory_space<vmem>>, %arg14: memref<8x128xf32, #tpu.memory_space<vmem>>) attributes {dimension_semantics = [#tpu.dimension_semantics<arbitrary>], iteration_bounds = array<i64: 1>, scalar_prefetch = 1 : i64, scratch_operands = 3 : i64, tpu.core_type = #tpu.core_type<tc>, window_params = [{pipeline_mode = #tpu.pipeline_mode<synchronous>, transform_indices = @transform_0, window_bounds = array<i64: 32, 128>}, {pipeline_mode = #tpu.pipeline_mode<synchronous>, transform_indices = @transform_1, window_bounds = array<i64: 1, 128>}, {pipeline_mode = #tpu.pipeline_mode<synchronous>, transform_indices = @transform_2, window_bounds = array<i64: 128, 384>}, {pipeline_mode = #tpu.pipeline_mode<synchronous>, transform_indices = @transform_3, window_bounds = array<i64: 1, 384>}, {pipeline_mode = #tpu.pipeline_mode<synchronous>, transform_indices = @transform_4, window_bounds = array<i64: 128, 384>}, {pipeline_mode = #tpu.pipeline_mode<synchronous>, transform_indices = @transform_5, window_bounds = array<i64: 1, 384>}, {pipeline_mode = #tpu.pipeline_mode<synchronous>, transform_indices = @transform_6, window_bounds = array<i64: 128, 128>}, {pipeline_mode = #tpu.pipeline_mode<synchronous>, transform_indices = @transform_7, window_bounds = array<i64: 1, 128>}, {pipeline_mode = #tpu.pipeline_mode<synchronous>, transform_indices = @transform_8, window_bounds = array<i64: 8, 128>}, {pipeline_mode = #tpu.pipeline_mode<synchronous>, transform_indices = @transform_9, window_bounds = array<i64: 1, 128>}]} {
    %c0_i32 = arith.constant 0 : i32
    %0 = arith.index_cast %c0_i32 : i32 to index
    %1 = memref.load %arg1[%0] : memref<8xi32, #tpu.memory_space<smem>>
    %2 = arith.index_cast %1 : i32 to index
    %c0 = arith.constant 0 : index
    %3 = vector.load %arg2[%2, %c0] : memref<32x128xf32, #tpu.memory_space<vmem>>, vector<1x128xf32>
    %4 = arith.index_cast %c0_i32 : i32 to index
    %c0_0 = arith.constant 0 : index
    %5 = vector.load %arg12[%4, %c0_0] : memref<8x128xf32, #tpu.memory_space<vmem>>, vector<1x128xf32>
    tpu.vector_store %arg12[%4, %c0_0], %3 {strides = array<i32>} : memref<8x128xf32, #tpu.memory_space<vmem>>, vector<1x128xf32>,
    %c1_i32 = arith.constant 1 : i32
    %6 = arith.index_cast %c1_i32 : i32 to index
    %7 = memref.load %arg1[%6] : memref<8xi32, #tpu.memory_space<smem>>
    %8 = arith.index_cast %7 : i32 to index
    %c0_1 = arith.constant 0 : index
    %9 = vector.load %arg2[%8, %c0_1] : memref<32x128xf32, #tpu.memory_space<vmem>>, vector<1x128xf32>
    %10 = arith.index_cast %c1_i32 : i32 to index
    %c0_2 = arith.constant 0 : index
    %11 = vector.load %arg12[%10, %c0_2] : memref<8x128xf32, #tpu.memory_space<vmem>>, vector<1x128xf32>
    tpu.vector_store %arg12[%10, %c0_2], %9 {strides = array<i32>} : memref<8x128xf32, #tpu.memory_space<vmem>>, vector<1x128xf32>,
    %c2_i32 = arith.constant 2 : i32
    %12 = arith.index_cast %c2_i32 : i32 to index
    %13 = memref.load %arg1[%12] : memref<8xi32, #tpu.memory_space<smem>>
    %14 = arith.index_cast %13 : i32 to index
    %c0_3 = arith.constant 0 : index
    %15 = vector.load %arg2[%14, %c0_3] : memref<32x128xf32, #tpu.memory_space<vmem>>, vector<1x128xf32>
    %16 = arith.index_cast %c2_i32 : i32 to index
    %c0_4 = arith.constant 0 : index
    %17 = vector.load %arg12[%16, %c0_4] : memref<8x128xf32, #tpu.memory_space<vmem>>, vector<1x128xf32>
    tpu.vector_store %arg12[%16, %c0_4], %15 {strides = array<i32>} : memref<8x128xf32, #tpu.memory_space<vmem>>, vector<1x128xf32>,
    %c3_i32 = arith.constant 3 : i32
    %18 = arith.index_cast %c3_i32 : i32 to index
    %19 = memref.load %arg1[%18] : memref<8xi32, #tpu.memory_space<smem>>
    %20 = arith.index_cast %19 : i32 to index
    %c0_5 = arith.constant 0 : index
    %21 = vector.load %arg2[%20, %c0_5] : memref<32x128xf32, #tpu.memory_space<vmem>>, vector<1x128xf32>
    %22 = arith.index_cast %c3_i32 : i32 to index
    %c0_6 = arith.constant 0 : index
    %23 = vector.load %arg12[%22, %c0_6] : memref<8x128xf32, #tpu.memory_space<vmem>>, vector<1x128xf32>
    tpu.vector_store %arg12[%22, %c0_6], %21 {strides = array<i32>} : memref<8x128xf32, #tpu.memory_space<vmem>>, vector<1x128xf32>,
    %c4_i32 = arith.constant 4 : i32
    %24 = arith.index_cast %c4_i32 : i32 to index
    %25 = memref.load %arg1[%24] : memref<8xi32, #tpu.memory_space<smem>>
    %26 = arith.index_cast %25 : i32 to index
    %c0_7 = arith.constant 0 : index
    %27 = vector.load %arg2[%26, %c0_7] : memref<32x128xf32, #tpu.memory_space<vmem>>, vector<1x128xf32>
    %28 = arith.index_cast %c4_i32 : i32 to index
    %c0_8 = arith.constant 0 : index
    %29 = vector.load %arg12[%28, %c0_8] : memref<8x128xf32, #tpu.memory_space<vmem>>, vector<1x128xf32>
    tpu.vector_store %arg12[%28, %c0_8], %27 {strides = array<i32>} : memref<8x128xf32, #tpu.memory_space<vmem>>, vector<1x128xf32>,
    %c5_i32 = arith.constant 5 : i32
    %30 = arith.index_cast %c5_i32 : i32 to index
    %31 = memref.load %arg1[%30] : memref<8xi32, #tpu.memory_space<smem>>
    %32 = arith.index_cast %31 : i32 to index
    %c0_9 = arith.constant 0 : index
    %33 = vector.load %arg2[%32, %c0_9] : memref<32x128xf32, #tpu.memory_space<vmem>>, vector<1x128xf32>
    %34 = arith.index_cast %c5_i32 : i32 to index
    %c0_10 = arith.constant 0 : index
    %35 = vector.load %arg12[%34, %c0_10] : memref<8x128xf32, #tpu.memory_space<vmem>>, vector<1x128xf32>
    tpu.vector_store %arg12[%34, %c0_10], %33 {strides = array<i32>} : memref<8x128xf32, #tpu.memory_space<vmem>>, vector<1x128xf32>,
    %c6_i32 = arith.constant 6 : i32
    %36 = arith.index_cast %c6_i32 : i32 to index
    %37 = memref.load %arg1[%36] : memref<8xi32, #tpu.memory_space<smem>>
    %38 = arith.index_cast %37 : i32 to index
    %c0_11 = arith.constant 0 : index
    %39 = vector.load %arg2[%38, %c0_11] : memref<32x128xf32, #tpu.memory_space<vmem>>, vector<1x128xf32>
    %40 = arith.index_cast %c6_i32 : i32 to index
    %c0_12 = arith.constant 0 : index
    %41 = vector.load %arg12[%40, %c0_12] : memref<8x128xf32, #tpu.memory_space<vmem>>, vector<1x128xf32>
    tpu.vector_store %arg12[%40, %c0_12], %39 {strides = array<i32>} : memref<8x128xf32, #tpu.memory_space<vmem>>, vector<1x128xf32>,
    %c7_i32 = arith.constant 7 : i32
    %42 = arith.index_cast %c7_i32 : i32 to index
    %43 = memref.load %arg1[%42] : memref<8xi32, #tpu.memory_space<smem>>
    %44 = arith.index_cast %43 : i32 to index
    %c0_13 = arith.constant 0 : index
    %45 = vector.load %arg2[%44, %c0_13] : memref<32x128xf32, #tpu.memory_space<vmem>>, vector<1x128xf32>
    %46 = arith.index_cast %c7_i32 : i32 to index
    %c0_14 = arith.constant 0 : index
    %47 = vector.load %arg12[%46, %c0_14] : memref<8x128xf32, #tpu.memory_space<vmem>>, vector<1x128xf32>
    tpu.vector_store %arg12[%46, %c0_14], %45 {strides = array<i32>} : memref<8x128xf32, #tpu.memory_space<vmem>>, vector<1x128xf32>,
    %c8_i32 = arith.constant 8 : i32
    %c0_15 = arith.constant 0 : index
    %c0_16 = arith.constant 0 : index
    %48 = vector.load %arg12[%c0_15, %c0_16] : memref<8x128xf32, #tpu.memory_space<vmem>>, vector<8x128xf32>
    %c0_17 = arith.constant 0 : index
    %c0_18 = arith.constant 0 : index
    %49 = vector.load %arg4[%c0_17, %c0_18] : memref<128x384xf32, #tpu.memory_space<vmem>>, vector<128x384xf32>
    %cst = arith.constant dense<0.000000e+00> : vector<8x384xf32>
    %50 = tpu.matmul %48, %49, %cst {dimension_numbers = #tpu.dot_dimension_numbers<[1], [0], [0], [1], [0, 0, 1, 1], [], []>} : vector<8x128xf32>, vector<128x384xf32>, vector<8x384xf32> -> vector<8x384xf32>
    %c0_19 = arith.constant 0 : index
    %c0_20 = arith.constant 0 : index
    %51 = vector.load %arg5[%c0_19, %c0_20] : memref<1x384xf32, #tpu.memory_space<vmem>>, vector<1x384xf32>
    %52 = vector.broadcast %51 : vector<1x384xf32> to vector<8x384xf32>
    %53 = arith.addf %50, %52 : vector<8x384xf32>
    %c0_21 = arith.constant 0 : index
    %c0_22 = arith.constant 0 : index
    %54 = vector.load %arg13[%c0_21, %c0_22] : memref<8x384xf32, #tpu.memory_space<vmem>>, vector<8x384xf32>
    tpu.vector_store %arg13[%c0_21, %c0_22], %53 {strides = array<i32>} : memref<8x384xf32, #tpu.memory_space<vmem>>, vector<8x384xf32>,
    %c0_23 = arith.constant 0 : index
    %c0_24 = arith.constant 0 : index
    %55 = vector.load %arg3[%c0_23, %c0_24] : memref<1x128xf32, #tpu.memory_space<vmem>>, vector<1x128xf32>
    %c0_i32_25 = arith.constant 0 : i32
    %c0_26 = arith.constant 0 : index
    %c0_27 = arith.constant 0 : index
    %56 = vector.load %arg6[%c0_26, %c0_27] : memref<128x384xf32, #tpu.memory_space<vmem>>, vector<128x384xf32>
    %cst_28 = arith.constant dense<0.000000e+00> : vector<1x384xf32>
    %57 = tpu.matmul %55, %56, %cst_28 {dimension_numbers = #tpu.dot_dimension_numbers<[1], [0], [0], [1], [0, 0, 1, 1], [], []>} : vector<1x128xf32>, vector<128x384xf32>, vector<1x384xf32> -> vector<1x384xf32>
    %c0_29 = arith.constant 0 : index
    %c0_30 = arith.constant 0 : index
    %58 = vector.load %arg7[%c0_29, %c0_30] : memref<1x384xf32, #tpu.memory_space<vmem>>, vector<1x384xf32>
    %59 = arith.addf %57, %58 : vector<1x384xf32>
    %60 = arith.index_cast %c0_i32_25 : i32 to index
    %c0_31 = arith.constant 0 : index
    %61 = vector.load %arg13[%60, %c0_31] : memref<8x384xf32, #tpu.memory_space<vmem>>, vector<1x384xf32>
    %62 = vector.extract_strided_slice %61 {offsets = [0, 0], sizes = [1, 128], strides = [1, 1]} : vector<1x384xf32> to vector<1x128xf32>
    %63 = vector.extract_strided_slice %59 {offsets = [0, 0], sizes = [1, 128], strides = [1, 1]} : vector<1x384xf32> to vector<1x128xf32>
    %64 = arith.addf %62, %63 : vector<1x128xf32>
    %65 = arith.negf %64 : vector<1x128xf32>
    %66 = math.exp %65 : vector<1x128xf32>
    %cst_32 = arith.constant 1.000000e+00 : f32
    %67 = vector.broadcast %cst_32 : f32 to vector<1x128xf32>
    %68 = arith.addf %67, %66 : vector<1x128xf32>
    %69 = arith.divf %67, %68 : vector<1x128xf32>
    %70 = vector.extract_strided_slice %61 {offsets = [0, 128], sizes = [1, 128], strides = [1, 1]} : vector<1x384xf32> to vector<1x128xf32>
    %71 = vector.extract_strided_slice %59 {offsets = [0, 128], sizes = [1, 128], strides = [1, 1]} : vector<1x384xf32> to vector<1x128xf32>
    %72 = arith.addf %70, %71 : vector<1x128xf32>
    %73 = arith.negf %72 : vector<1x128xf32>
    %74 = math.exp %73 : vector<1x128xf32>
    %cst_33 = arith.constant 1.000000e+00 : f32
    %75 = vector.broadcast %cst_33 : f32 to vector<1x128xf32>
    %76 = arith.addf %75, %74 : vector<1x128xf32>
    %77 = arith.divf %75, %76 : vector<1x128xf32>
    %78 = vector.extract_strided_slice %61 {offsets = [0, 256], sizes = [1, 128], strides = [1, 1]} : vector<1x384xf32> to vector<1x128xf32>
    %79 = vector.extract_strided_slice %59 {offsets = [0, 256], sizes = [1, 128], strides = [1, 1]} : vector<1x384xf32> to vector<1x128xf32>
    %80 = arith.mulf %69, %79 : vector<1x128xf32>
    %81 = arith.addf %78, %80 : vector<1x128xf32>
    %82 = math.tanh %81 : vector<1x128xf32>
    %83 = arith.subf %55, %82 : vector<1x128xf32>
    %84 = arith.mulf %77, %83 : vector<1x128xf32>
    %85 = arith.addf %82, %84 : vector<1x128xf32>
    %86 = arith.index_cast %c0_i32_25 : i32 to index
    %c0_34 = arith.constant 0 : index
    %87 = vector.load %arg14[%86, %c0_34] : memref<8x128xf32, #tpu.memory_space<vmem>>, vector<1x128xf32>
    tpu.vector_store %arg14[%86, %c0_34], %85 {strides = array<i32>} : memref<8x128xf32, #tpu.memory_space<vmem>>, vector<1x128xf32>,
    %c1_i32_35 = arith.constant 1 : i32
    %c0_36 = arith.constant 0 : index
    %c0_37 = arith.constant 0 : index
    %88 = vector.load %arg6[%c0_36, %c0_37] : memref<128x384xf32, #tpu.memory_space<vmem>>, vector<128x384xf32>
    %cst_38 = arith.constant dense<0.000000e+00> : vector<1x384xf32>
    %89 = tpu.matmul %85, %88, %cst_38 {dimension_numbers = #tpu.dot_dimension_numbers<[1], [0], [0], [1], [0, 0, 1, 1], [], []>} : vector<1x128xf32>, vector<128x384xf32>, vector<1x384xf32> -> vector<1x384xf32>
    %c0_39 = arith.constant 0 : index
    %c0_40 = arith.constant 0 : index
    %90 = vector.load %arg7[%c0_39, %c0_40] : memref<1x384xf32, #tpu.memory_space<vmem>>, vector<1x384xf32>
    %91 = arith.addf %89, %90 : vector<1x384xf32>
    %92 = arith.index_cast %c1_i32_35 : i32 to index
    %c0_41 = arith.constant 0 : index
    %93 = vector.load %arg13[%92, %c0_41] : memref<8x384xf32, #tpu.memory_space<vmem>>, vector<1x384xf32>
    %94 = vector.extract_strided_slice %93 {offsets = [0, 0], sizes = [1, 128], strides = [1, 1]} : vector<1x384xf32> to vector<1x128xf32>
    %95 = vector.extract_strided_slice %91 {offsets = [0, 0], sizes = [1, 128], strides = [1, 1]} : vector<1x384xf32> to vector<1x128xf32>
    %96 = arith.addf %94, %95 : vector<1x128xf32>
    %97 = arith.negf %96 : vector<1x128xf32>
    %98 = math.exp %97 : vector<1x128xf32>
    %cst_42 = arith.constant 1.000000e+00 : f32
    %99 = vector.broadcast %cst_42 : f32 to vector<1x128xf32>
    %100 = arith.addf %99, %98 : vector<1x128xf32>
    %101 = arith.divf %99, %100 : vector<1x128xf32>
    %102 = vector.extract_strided_slice %93 {offsets = [0, 128], sizes = [1, 128], strides = [1, 1]} : vector<1x384xf32> to vector<1x128xf32>
    %103 = vector.extract_strided_slice %91 {offsets = [0, 128], sizes = [1, 128], strides = [1, 1]} : vector<1x384xf32> to vector<1x128xf32>
    %104 = arith.addf %102, %103 : vector<1x128xf32>
    %105 = arith.negf %104 : vector<1x128xf32>
    %106 = math.exp %105 : vector<1x128xf32>
    %cst_43 = arith.constant 1.000000e+00 : f32
    %107 = vector.broadcast %cst_43 : f32 to vector<1x128xf32>
    %108 = arith.addf %107, %106 : vector<1x128xf32>
    %109 = arith.divf %107, %108 : vector<1x128xf32>
    %110 = vector.extract_strided_slice %93 {offsets = [0, 256], sizes = [1, 128], strides = [1, 1]} : vector<1x384xf32> to vector<1x128xf32>
    %111 = vector.extract_strided_slice %91 {offsets = [0, 256], sizes = [1, 128], strides = [1, 1]} : vector<1x384xf32> to vector<1x128xf32>
    %112 = arith.mulf %101, %111 : vector<1x128xf32>
    %113 = arith.addf %110, %112 : vector<1x128xf32>
    %114 = math.tanh %113 : vector<1x128xf32>
    %115 = arith.subf %85, %114 : vector<1x128xf32>
    %116 = arith.mulf %109, %115 : vector<1x128xf32>
    %117 = arith.addf %114, %116 : vector<1x128xf32>
    %118 = arith.index_cast %c1_i32_35 : i32 to index
    %c0_44 = arith.constant 0 : index
    %119 = vector.load %arg14[%118, %c0_44] : memref<8x128xf32, #tpu.memory_space<vmem>>, vector<1x128xf32>
    tpu.vector_store %arg14[%118, %c0_44], %117 {strides = array<i32>} : memref<8x128xf32, #tpu.memory_space<vmem>>, vector<1x128xf32>,
    %c2_i32_45 = arith.constant 2 : i32
    %c0_46 = arith.constant 0 : index
    %c0_47 = arith.constant 0 : index
    %120 = vector.load %arg6[%c0_46, %c0_47] : memref<128x384xf32, #tpu.memory_space<vmem>>, vector<128x384xf32>
    %cst_48 = arith.constant dense<0.000000e+00> : vector<1x384xf32>
    %121 = tpu.matmul %117, %120, %cst_48 {dimension_numbers = #tpu.dot_dimension_numbers<[1], [0], [0], [1], [0, 0, 1, 1], [], []>} : vector<1x128xf32>, vector<128x384xf32>, vector<1x384xf32> -> vector<1x384xf32>
    %c0_49 = arith.constant 0 : index
    %c0_50 = arith.constant 0 : index
    %122 = vector.load %arg7[%c0_49, %c0_50] : memref<1x384xf32, #tpu.memory_space<vmem>>, vector<1x384xf32>
    %123 = arith.addf %121, %122 : vector<1x384xf32>
    %124 = arith.index_cast %c2_i32_45 : i32 to index
    %c0_51 = arith.constant 0 : index
    %125 = vector.load %arg13[%124, %c0_51] : memref<8x384xf32, #tpu.memory_space<vmem>>, vector<1x384xf32>
    %126 = vector.extract_strided_slice %125 {offsets = [0, 0], sizes = [1, 128], strides = [1, 1]} : vector<1x384xf32> to vector<1x128xf32>
    %127 = vector.extract_strided_slice %123 {offsets = [0, 0], sizes = [1, 128], strides = [1, 1]} : vector<1x384xf32> to vector<1x128xf32>
    %128 = arith.addf %126, %127 : vector<1x128xf32>
    %129 = arith.negf %128 : vector<1x128xf32>
    %130 = math.exp %129 : vector<1x128xf32>
    %cst_52 = arith.constant 1.000000e+00 : f32
    %131 = vector.broadcast %cst_52 : f32 to vector<1x128xf32>
    %132 = arith.addf %131, %130 : vector<1x128xf32>
    %133 = arith.divf %131, %132 : vector<1x128xf32>
    %134 = vector.extract_strided_slice %125 {offsets = [0, 128], sizes = [1, 128], strides = [1, 1]} : vector<1x384xf32> to vector<1x128xf32>
    %135 = vector.extract_strided_slice %123 {offsets = [0, 128], sizes = [1, 128], strides = [1, 1]} : vector<1x384xf32> to vector<1x128xf32>
    %136 = arith.addf %134, %135 : vector<1x128xf32>
    %137 = arith.negf %136 : vector<1x128xf32>
    %138 = math.exp %137 : vector<1x128xf32>
    %cst_53 = arith.constant 1.000000e+00 : f32
    %139 = vector.broadcast %cst_53 : f32 to vector<1x128xf32>
    %140 = arith.addf %139, %138 : vector<1x128xf32>
    %141 = arith.divf %139, %140 : vector<1x128xf32>
    %142 = vector.extract_strided_slice %125 {offsets = [0, 256], sizes = [1, 128], strides = [1, 1]} : vector<1x384xf32> to vector<1x128xf32>
    %143 = vector.extract_strided_slice %123 {offsets = [0, 256], sizes = [1, 128], strides = [1, 1]} : vector<1x384xf32> to vector<1x128xf32>
    %144 = arith.mulf %133, %143 : vector<1x128xf32>
    %145 = arith.addf %142, %144 : vector<1x128xf32>
    %146 = math.tanh %145 : vector<1x128xf32>
    %147 = arith.subf %117, %146 : vector<1x128xf32>
    %148 = arith.mulf %141, %147 : vector<1x128xf32>
    %149 = arith.addf %146, %148 : vector<1x128xf32>
    %150 = arith.index_cast %c2_i32_45 : i32 to index
    %c0_54 = arith.constant 0 : index
    %151 = vector.load %arg14[%150, %c0_54] : memref<8x128xf32, #tpu.memory_space<vmem>>, vector<1x128xf32>
    tpu.vector_store %arg14[%150, %c0_54], %149 {strides = array<i32>} : memref<8x128xf32, #tpu.memory_space<vmem>>, vector<1x128xf32>,
    %c3_i32_55 = arith.constant 3 : i32
    %c0_56 = arith.constant 0 : index
    %c0_57 = arith.constant 0 : index
    %152 = vector.load %arg6[%c0_56, %c0_57] : memref<128x384xf32, #tpu.memory_space<vmem>>, vector<128x384xf32>
    %cst_58 = arith.constant dense<0.000000e+00> : vector<1x384xf32>
    %153 = tpu.matmul %149, %152, %cst_58 {dimension_numbers = #tpu.dot_dimension_numbers<[1], [0], [0], [1], [0, 0, 1, 1], [], []>} : vector<1x128xf32>, vector<128x384xf32>, vector<1x384xf32> -> vector<1x384xf32>
    %c0_59 = arith.constant 0 : index
    %c0_60 = arith.constant 0 : index
    %154 = vector.load %arg7[%c0_59, %c0_60] : memref<1x384xf32, #tpu.memory_space<vmem>>, vector<1x384xf32>
    %155 = arith.addf %153, %154 : vector<1x384xf32>
    %156 = arith.index_cast %c3_i32_55 : i32 to index
    %c0_61 = arith.constant 0 : index
    %157 = vector.load %arg13[%156, %c0_61] : memref<8x384xf32, #tpu.memory_space<vmem>>, vector<1x384xf32>
    %158 = vector.extract_strided_slice %157 {offsets = [0, 0], sizes = [1, 128], strides = [1, 1]} : vector<1x384xf32> to vector<1x128xf32>
    %159 = vector.extract_strided_slice %155 {offsets = [0, 0], sizes = [1, 128], strides = [1, 1]} : vector<1x384xf32> to vector<1x128xf32>
    %160 = arith.addf %158, %159 : vector<1x128xf32>
    %161 = arith.negf %160 : vector<1x128xf32>
    %162 = math.exp %161 : vector<1x128xf32>
    %cst_62 = arith.constant 1.000000e+00 : f32
    %163 = vector.broadcast %cst_62 : f32 to vector<1x128xf32>
    %164 = arith.addf %163, %162 : vector<1x128xf32>
    %165 = arith.divf %163, %164 : vector<1x128xf32>
    %166 = vector.extract_strided_slice %157 {offsets = [0, 128], sizes = [1, 128], strides = [1, 1]} : vector<1x384xf32> to vector<1x128xf32>
    %167 = vector.extract_strided_slice %155 {offsets = [0, 128], sizes = [1, 128], strides = [1, 1]} : vector<1x384xf32> to vector<1x128xf32>
    %168 = arith.addf %166, %167 : vector<1x128xf32>
    %169 = arith.negf %168 : vector<1x128xf32>
    %170 = math.exp %169 : vector<1x128xf32>
    %cst_63 = arith.constant 1.000000e+00 : f32
    %171 = vector.broadcast %cst_63 : f32 to vector<1x128xf32>
    %172 = arith.addf %171, %170 : vector<1x128xf32>
    %173 = arith.divf %171, %172 : vector<1x128xf32>
    %174 = vector.extract_strided_slice %157 {offsets = [0, 256], sizes = [1, 128], strides = [1, 1]} : vector<1x384xf32> to vector<1x128xf32>
    %175 = vector.extract_strided_slice %155 {offsets = [0, 256], sizes = [1, 128], strides = [1, 1]} : vector<1x384xf32> to vector<1x128xf32>
    %176 = arith.mulf %165, %175 : vector<1x128xf32>
    %177 = arith.addf %174, %176 : vector<1x128xf32>
    %178 = math.tanh %177 : vector<1x128xf32>
    %179 = arith.subf %149, %178 : vector<1x128xf32>
    %180 = arith.mulf %173, %179 : vector<1x128xf32>
    %181 = arith.addf %178, %180 : vector<1x128xf32>
    %182 = arith.index_cast %c3_i32_55 : i32 to index
    %c0_64 = arith.constant 0 : index
    %183 = vector.load %arg14[%182, %c0_64] : memref<8x128xf32, #tpu.memory_space<vmem>>, vector<1x128xf32>
    tpu.vector_store %arg14[%182, %c0_64], %181 {strides = array<i32>} : memref<8x128xf32, #tpu.memory_space<vmem>>, vector<1x128xf32>,
    %c4_i32_65 = arith.constant 4 : i32
    %c0_66 = arith.constant 0 : index
    %c0_67 = arith.constant 0 : index
    %184 = vector.load %arg6[%c0_66, %c0_67] : memref<128x384xf32, #tpu.memory_space<vmem>>, vector<128x384xf32>
    %cst_68 = arith.constant dense<0.000000e+00> : vector<1x384xf32>
    %185 = tpu.matmul %181, %184, %cst_68 {dimension_numbers = #tpu.dot_dimension_numbers<[1], [0], [0], [1], [0, 0, 1, 1], [], []>} : vector<1x128xf32>, vector<128x384xf32>, vector<1x384xf32> -> vector<1x384xf32>
    %c0_69 = arith.constant 0 : index
    %c0_70 = arith.constant 0 : index
    %186 = vector.load %arg7[%c0_69, %c0_70] : memref<1x384xf32, #tpu.memory_space<vmem>>, vector<1x384xf32>
    %187 = arith.addf %185, %186 : vector<1x384xf32>
    %188 = arith.index_cast %c4_i32_65 : i32 to index
    %c0_71 = arith.constant 0 : index
    %189 = vector.load %arg13[%188, %c0_71] : memref<8x384xf32, #tpu.memory_space<vmem>>, vector<1x384xf32>
    %190 = vector.extract_strided_slice %189 {offsets = [0, 0], sizes = [1, 128], strides = [1, 1]} : vector<1x384xf32> to vector<1x128xf32>
    %191 = vector.extract_strided_slice %187 {offsets = [0, 0], sizes = [1, 128], strides = [1, 1]} : vector<1x384xf32> to vector<1x128xf32>
    %192 = arith.addf %190, %191 : vector<1x128xf32>
    %193 = arith.negf %192 : vector<1x128xf32>
    %194 = math.exp %193 : vector<1x128xf32>
    %cst_72 = arith.constant 1.000000e+00 : f32
    %195 = vector.broadcast %cst_72 : f32 to vector<1x128xf32>
    %196 = arith.addf %195, %194 : vector<1x128xf32>
    %197 = arith.divf %195, %196 : vector<1x128xf32>
    %198 = vector.extract_strided_slice %189 {offsets = [0, 128], sizes = [1, 128], strides = [1, 1]} : vector<1x384xf32> to vector<1x128xf32>
    %199 = vector.extract_strided_slice %187 {offsets = [0, 128], sizes = [1, 128], strides = [1, 1]} : vector<1x384xf32> to vector<1x128xf32>
    %200 = arith.addf %198, %199 : vector<1x128xf32>
    %201 = arith.negf %200 : vector<1x128xf32>
    %202 = math.exp %201 : vector<1x128xf32>
    %cst_73 = arith.constant 1.000000e+00 : f32
    %203 = vector.broadcast %cst_73 : f32 to vector<1x128xf32>
    %204 = arith.addf %203, %202 : vector<1x128xf32>
    %205 = arith.divf %203, %204 : vector<1x128xf32>
    %206 = vector.extract_strided_slice %189 {offsets = [0, 256], sizes = [1, 128], strides = [1, 1]} : vector<1x384xf32> to vector<1x128xf32>
    %207 = vector.extract_strided_slice %187 {offsets = [0, 256], sizes = [1, 128], strides = [1, 1]} : vector<1x384xf32> to vector<1x128xf32>
    %208 = arith.mulf %197, %207 : vector<1x128xf32>
    %209 = arith.addf %206, %208 : vector<1x128xf32>
    %210 = math.tanh %209 : vector<1x128xf32>
    %211 = arith.subf %181, %210 : vector<1x128xf32>
    %212 = arith.mulf %205, %211 : vector<1x128xf32>
    %213 = arith.addf %210, %212 : vector<1x128xf32>
    %214 = arith.index_cast %c4_i32_65 : i32 to index
    %c0_74 = arith.constant 0 : index
    %215 = vector.load %arg14[%214, %c0_74] : memref<8x128xf32, #tpu.memory_space<vmem>>, vector<1x128xf32>
    tpu.vector_store %arg14[%214, %c0_74], %213 {strides = array<i32>} : memref<8x128xf32, #tpu.memory_space<vmem>>, vector<1x128xf32>,
    %c5_i32_75 = arith.constant 5 : i32
    %c0_76 = arith.constant 0 : index
    %c0_77 = arith.constant 0 : index
    %216 = vector.load %arg6[%c0_76, %c0_77] : memref<128x384xf32, #tpu.memory_space<vmem>>, vector<128x384xf32>
    %cst_78 = arith.constant dense<0.000000e+00> : vector<1x384xf32>
    %217 = tpu.matmul %213, %216, %cst_78 {dimension_numbers = #tpu.dot_dimension_numbers<[1], [0], [0], [1], [0, 0, 1, 1], [], []>} : vector<1x128xf32>, vector<128x384xf32>, vector<1x384xf32> -> vector<1x384xf32>
    %c0_79 = arith.constant 0 : index
    %c0_80 = arith.constant 0 : index
    %218 = vector.load %arg7[%c0_79, %c0_80] : memref<1x384xf32, #tpu.memory_space<vmem>>, vector<1x384xf32>
    %219 = arith.addf %217, %218 : vector<1x384xf32>
    %220 = arith.index_cast %c5_i32_75 : i32 to index
    %c0_81 = arith.constant 0 : index
    %221 = vector.load %arg13[%220, %c0_81] : memref<8x384xf32, #tpu.memory_space<vmem>>, vector<1x384xf32>
    %222 = vector.extract_strided_slice %221 {offsets = [0, 0], sizes = [1, 128], strides = [1, 1]} : vector<1x384xf32> to vector<1x128xf32>
    %223 = vector.extract_strided_slice %219 {offsets = [0, 0], sizes = [1, 128], strides = [1, 1]} : vector<1x384xf32> to vector<1x128xf32>
    %224 = arith.addf %222, %223 : vector<1x128xf32>
    %225 = arith.negf %224 : vector<1x128xf32>
    %226 = math.exp %225 : vector<1x128xf32>
    %cst_82 = arith.constant 1.000000e+00 : f32
    %227 = vector.broadcast %cst_82 : f32 to vector<1x128xf32>
    %228 = arith.addf %227, %226 : vector<1x128xf32>
    %229 = arith.divf %227, %228 : vector<1x128xf32>
    %230 = vector.extract_strided_slice %221 {offsets = [0, 128], sizes = [1, 128], strides = [1, 1]} : vector<1x384xf32> to vector<1x128xf32>
    %231 = vector.extract_strided_slice %219 {offsets = [0, 128], sizes = [1, 128], strides = [1, 1]} : vector<1x384xf32> to vector<1x128xf32>
    %232 = arith.addf %230, %231 : vector<1x128xf32>
    %233 = arith.negf %232 : vector<1x128xf32>
    %234 = math.exp %233 : vector<1x128xf32>
    %cst_83 = arith.constant 1.000000e+00 : f32
    %235 = vector.broadcast %cst_83 : f32 to vector<1x128xf32>
    %236 = arith.addf %235, %234 : vector<1x128xf32>
    %237 = arith.divf %235, %236 : vector<1x128xf32>
    %238 = vector.extract_strided_slice %221 {offsets = [0, 256], sizes = [1, 128], strides = [1, 1]} : vector<1x384xf32> to vector<1x128xf32>
    %239 = vector.extract_strided_slice %219 {offsets = [0, 256], sizes = [1, 128], strides = [1, 1]} : vector<1x384xf32> to vector<1x128xf32>
    %240 = arith.mulf %229, %239 : vector<1x128xf32>
    %241 = arith.addf %238, %240 : vector<1x128xf32>
    %242 = math.tanh %241 : vector<1x128xf32>
    %243 = arith.subf %213, %242 : vector<1x128xf32>
    %244 = arith.mulf %237, %243 : vector<1x128xf32>
    %245 = arith.addf %242, %244 : vector<1x128xf32>
    %246 = arith.index_cast %c5_i32_75 : i32 to index
    %c0_84 = arith.constant 0 : index
    %247 = vector.load %arg14[%246, %c0_84] : memref<8x128xf32, #tpu.memory_space<vmem>>, vector<1x128xf32>
    tpu.vector_store %arg14[%246, %c0_84], %245 {strides = array<i32>} : memref<8x128xf32, #tpu.memory_space<vmem>>, vector<1x128xf32>,
    %c6_i32_85 = arith.constant 6 : i32
    %c0_86 = arith.constant 0 : index
    %c0_87 = arith.constant 0 : index
    %248 = vector.load %arg6[%c0_86, %c0_87] : memref<128x384xf32, #tpu.memory_space<vmem>>, vector<128x384xf32>
    %cst_88 = arith.constant dense<0.000000e+00> : vector<1x384xf32>
    %249 = tpu.matmul %245, %248, %cst_88 {dimension_numbers = #tpu.dot_dimension_numbers<[1], [0], [0], [1], [0, 0, 1, 1], [], []>} : vector<1x128xf32>, vector<128x384xf32>, vector<1x384xf32> -> vector<1x384xf32>
    %c0_89 = arith.constant 0 : index
    %c0_90 = arith.constant 0 : index
    %250 = vector.load %arg7[%c0_89, %c0_90] : memref<1x384xf32, #tpu.memory_space<vmem>>, vector<1x384xf32>
    %251 = arith.addf %249, %250 : vector<1x384xf32>
    %252 = arith.index_cast %c6_i32_85 : i32 to index
    %c0_91 = arith.constant 0 : index
    %253 = vector.load %arg13[%252, %c0_91] : memref<8x384xf32, #tpu.memory_space<vmem>>, vector<1x384xf32>
    %254 = vector.extract_strided_slice %253 {offsets = [0, 0], sizes = [1, 128], strides = [1, 1]} : vector<1x384xf32> to vector<1x128xf32>
    %255 = vector.extract_strided_slice %251 {offsets = [0, 0], sizes = [1, 128], strides = [1, 1]} : vector<1x384xf32> to vector<1x128xf32>
    %256 = arith.addf %254, %255 : vector<1x128xf32>
    %257 = arith.negf %256 : vector<1x128xf32>
    %258 = math.exp %257 : vector<1x128xf32>
    %cst_92 = arith.constant 1.000000e+00 : f32
    %259 = vector.broadcast %cst_92 : f32 to vector<1x128xf32>
    %260 = arith.addf %259, %258 : vector<1x128xf32>
    %261 = arith.divf %259, %260 : vector<1x128xf32>
    %262 = vector.extract_strided_slice %253 {offsets = [0, 128], sizes = [1, 128], strides = [1, 1]} : vector<1x384xf32> to vector<1x128xf32>
    %263 = vector.extract_strided_slice %251 {offsets = [0, 128], sizes = [1, 128], strides = [1, 1]} : vector<1x384xf32> to vector<1x128xf32>
    %264 = arith.addf %262, %263 : vector<1x128xf32>
    %265 = arith.negf %264 : vector<1x128xf32>
    %266 = math.exp %265 : vector<1x128xf32>
    %cst_93 = arith.constant 1.000000e+00 : f32
    %267 = vector.broadcast %cst_93 : f32 to vector<1x128xf32>
    %268 = arith.addf %267, %266 : vector<1x128xf32>
    %269 = arith.divf %267, %268 : vector<1x128xf32>
    %270 = vector.extract_strided_slice %253 {offsets = [0, 256], sizes = [1, 128], strides = [1, 1]} : vector<1x384xf32> to vector<1x128xf32>
    %271 = vector.extract_strided_slice %251 {offsets = [0, 256], sizes = [1, 128], strides = [1, 1]} : vector<1x384xf32> to vector<1x128xf32>
    %272 = arith.mulf %261, %271 : vector<1x128xf32>
    %273 = arith.addf %270, %272 : vector<1x128xf32>
    %274 = math.tanh %273 : vector<1x128xf32>
    %275 = arith.subf %245, %274 : vector<1x128xf32>
    %276 = arith.mulf %269, %275 : vector<1x128xf32>
    %277 = arith.addf %274, %276 : vector<1x128xf32>
    %278 = arith.index_cast %c6_i32_85 : i32 to index
    %c0_94 = arith.constant 0 : index
    %279 = vector.load %arg14[%278, %c0_94] : memref<8x128xf32, #tpu.memory_space<vmem>>, vector<1x128xf32>
    tpu.vector_store %arg14[%278, %c0_94], %277 {strides = array<i32>} : memref<8x128xf32, #tpu.memory_space<vmem>>, vector<1x128xf32>,
    %c7_i32_95 = arith.constant 7 : i32
    %c0_96 = arith.constant 0 : index
    %c0_97 = arith.constant 0 : index
    %280 = vector.load %arg6[%c0_96, %c0_97] : memref<128x384xf32, #tpu.memory_space<vmem>>, vector<128x384xf32>
    %cst_98 = arith.constant dense<0.000000e+00> : vector<1x384xf32>
    %281 = tpu.matmul %277, %280, %cst_98 {dimension_numbers = #tpu.dot_dimension_numbers<[1], [0], [0], [1], [0, 0, 1, 1], [], []>} : vector<1x128xf32>, vector<128x384xf32>, vector<1x384xf32> -> vector<1x384xf32>
    %c0_99 = arith.constant 0 : index
    %c0_100 = arith.constant 0 : index
    %282 = vector.load %arg7[%c0_99, %c0_100] : memref<1x384xf32, #tpu.memory_space<vmem>>, vector<1x384xf32>
    %283 = arith.addf %281, %282 : vector<1x384xf32>
    %284 = arith.index_cast %c7_i32_95 : i32 to index
    %c0_101 = arith.constant 0 : index
    %285 = vector.load %arg13[%284, %c0_101] : memref<8x384xf32, #tpu.memory_space<vmem>>, vector<1x384xf32>
    %286 = vector.extract_strided_slice %285 {offsets = [0, 0], sizes = [1, 128], strides = [1, 1]} : vector<1x384xf32> to vector<1x128xf32>
    %287 = vector.extract_strided_slice %283 {offsets = [0, 0], sizes = [1, 128], strides = [1, 1]} : vector<1x384xf32> to vector<1x128xf32>
    %288 = arith.addf %286, %287 : vector<1x128xf32>
    %289 = arith.negf %288 : vector<1x128xf32>
    %290 = math.exp %289 : vector<1x128xf32>
    %cst_102 = arith.constant 1.000000e+00 : f32
    %291 = vector.broadcast %cst_102 : f32 to vector<1x128xf32>
    %292 = arith.addf %291, %290 : vector<1x128xf32>
    %293 = arith.divf %291, %292 : vector<1x128xf32>
    %294 = vector.extract_strided_slice %285 {offsets = [0, 128], sizes = [1, 128], strides = [1, 1]} : vector<1x384xf32> to vector<1x128xf32>
    %295 = vector.extract_strided_slice %283 {offsets = [0, 128], sizes = [1, 128], strides = [1, 1]} : vector<1x384xf32> to vector<1x128xf32>
    %296 = arith.addf %294, %295 : vector<1x128xf32>
    %297 = arith.negf %296 : vector<1x128xf32>
    %298 = math.exp %297 : vector<1x128xf32>
    %cst_103 = arith.constant 1.000000e+00 : f32
    %299 = vector.broadcast %cst_103 : f32 to vector<1x128xf32>
    %300 = arith.addf %299, %298 : vector<1x128xf32>
    %301 = arith.divf %299, %300 : vector<1x128xf32>
    %302 = vector.extract_strided_slice %285 {offsets = [0, 256], sizes = [1, 128], strides = [1, 1]} : vector<1x384xf32> to vector<1x128xf32>
    %303 = vector.extract_strided_slice %283 {offsets = [0, 256], sizes = [1, 128], strides = [1, 1]} : vector<1x384xf32> to vector<1x128xf32>
    %304 = arith.mulf %293, %303 : vector<1x128xf32>
    %305 = arith.addf %302, %304 : vector<1x128xf32>
    %306 = math.tanh %305 : vector<1x128xf32>
    %307 = arith.subf %277, %306 : vector<1x128xf32>
    %308 = arith.mulf %301, %307 : vector<1x128xf32>
    %309 = arith.addf %306, %308 : vector<1x128xf32>
    %310 = arith.index_cast %c7_i32_95 : i32 to index
    %c0_104 = arith.constant 0 : index
    %311 = vector.load %arg14[%310, %c0_104] : memref<8x128xf32, #tpu.memory_space<vmem>>, vector<1x128xf32>
    tpu.vector_store %arg14[%310, %c0_104], %309 {strides = array<i32>} : memref<8x128xf32, #tpu.memory_space<vmem>>, vector<1x128xf32>,
    %c8_i32_105 = arith.constant 8 : i32
    %c0_106 = arith.constant 0 : index
    %c0_107 = arith.constant 0 : index
    %312 = vector.load %arg14[%c0_106, %c0_107] : memref<8x128xf32, #tpu.memory_space<vmem>>, vector<8x128xf32>
    %c0_108 = arith.constant 0 : index
    %c0_109 = arith.constant 0 : index
    %313 = vector.load %arg8[%c0_108, %c0_109] : memref<128x128xf32, #tpu.memory_space<vmem>>, vector<128x128xf32>
    %cst_110 = arith.constant dense<0.000000e+00> : vector<8x128xf32>
    %314 = tpu.matmul %312, %313, %cst_110 {dimension_numbers = #tpu.dot_dimension_numbers<[1], [0], [0], [1], [0, 0, 1, 1], [], []>} : vector<8x128xf32>, vector<128x128xf32>, vector<8x128xf32> -> vector<8x128xf32>
    %c0_111 = arith.constant 0 : index
    %c0_112 = arith.constant 0 : index
    %315 = vector.load %arg9[%c0_111, %c0_112] : memref<1x128xf32, #tpu.memory_space<vmem>>, vector<1x128xf32>
    %316 = vector.broadcast %315 : vector<1x128xf32> to vector<8x128xf32>
    %317 = arith.addf %314, %316 : vector<8x128xf32>
    %c0_113 = arith.constant 0 : index
    %c0_114 = arith.constant 0 : index
    %318 = vector.load %arg10[%c0_113, %c0_114] : memref<8x128xf32, #tpu.memory_space<vmem>>, vector<8x128xf32>
    tpu.vector_store %arg10[%c0_113, %c0_114], %317 {strides = array<i32>} : memref<8x128xf32, #tpu.memory_space<vmem>>, vector<8x128xf32>,
    %c0_115 = arith.constant 0 : index
    %c0_116 = arith.constant 0 : index
    %319 = vector.load %arg11[%c0_115, %c0_116] : memref<1x128xf32, #tpu.memory_space<vmem>>, vector<1x128xf32>
    tpu.vector_store %arg11[%c0_115, %c0_116], %309 {strides = array<i32>} : memref<1x128xf32, #tpu.memory_space<vmem>>, vector<1x128xf32>,
    return
  }
  func.func @transform_0(%arg0: i32, %arg1: memref<8xi32, #tpu.memory_space<smem>>) -> (i32, i32) {
    %c0_i32 = arith.constant 0 : i32
    %c0_i32_0 = arith.constant 0 : i32
    %c0_i32_1 = arith.constant 0 : i32
    return %c0_i32, %c0_i32_0 : i32, i32
  }
  func.func @transform_1(%arg0: i32, %arg1: memref<8xi32, #tpu.memory_space<smem>>) -> (i32, i32) {
    %c0_i32 = arith.constant 0 : i32
    %c0_i32_0 = arith.constant 0 : i32
    %c0_i32_1 = arith.constant 0 : i32
    return %c0_i32, %c0_i32_0 : i32, i32
  }
  func.func @transform_2(%arg0: i32, %arg1: memref<8xi32, #tpu.memory_space<smem>>) -> (i32, i32) {
    %c0_i32 = arith.constant 0 : i32
    %c0_i32_0 = arith.constant 0 : i32
    %c0_i32_1 = arith.constant 0 : i32
    return %c0_i32, %c0_i32_0 : i32, i32
  }
  func.func @transform_3(%arg0: i32, %arg1: memref<8xi32, #tpu.memory_space<smem>>) -> (i32, i32) {
    %c0_i32 = arith.constant 0 : i32
    %c0_i32_0 = arith.constant 0 : i32
    %c0_i32_1 = arith.constant 0 : i32
    return %c0_i32, %c0_i32_0 : i32, i32
  }
  func.func @transform_4(%arg0: i32, %arg1: memref<8xi32, #tpu.memory_space<smem>>) -> (i32, i32) {
    %c0_i32 = arith.constant 0 : i32
    %c0_i32_0 = arith.constant 0 : i32
    %c0_i32_1 = arith.constant 0 : i32
    return %c0_i32, %c0_i32_0 : i32, i32
  }
  func.func @transform_5(%arg0: i32, %arg1: memref<8xi32, #tpu.memory_space<smem>>) -> (i32, i32) {
    %c0_i32 = arith.constant 0 : i32
    %c0_i32_0 = arith.constant 0 : i32
    %c0_i32_1 = arith.constant 0 : i32
    return %c0_i32, %c0_i32_0 : i32, i32
  }
  func.func @transform_6(%arg0: i32, %arg1: memref<8xi32, #tpu.memory_space<smem>>) -> (i32, i32) {
    %c0_i32 = arith.constant 0 : i32
    %c0_i32_0 = arith.constant 0 : i32
    %c0_i32_1 = arith.constant 0 : i32
    return %c0_i32, %c0_i32_0 : i32, i32
  }
  func.func @transform_7(%arg0: i32, %arg1: memref<8xi32, #tpu.memory_space<smem>>) -> (i32, i32) {
    %c0_i32 = arith.constant 0 : i32
    %c0_i32_0 = arith.constant 0 : i32
    %c0_i32_1 = arith.constant 0 : i32
    return %c0_i32, %c0_i32_0 : i32, i32
  }
  func.func @transform_8(%arg0: i32, %arg1: memref<8xi32, #tpu.memory_space<smem>>) -> (i32, i32) {
    %c0_i32 = arith.constant 0 : i32
    %c0_i32_0 = arith.constant 0 : i32
    %c0_i32_1 = arith.constant 0 : i32
    return %c0_i32, %c0_i32_0 : i32, i32
  }
  func.func @transform_9(%arg0: i32, %arg1: memref<8xi32, #tpu.memory_space<smem>>) -> (i32, i32) {
    %c0_i32 = arith.constant 0 : i32
    %c0_i32_0 = arith.constant 0 : i32
    %c0_i32_1 = arith.constant 0 : i32
    return %c0_i32, %c0_i32_0 : i32, i32
  }
}

</mosaic_0001>

<bundles_post_ra>
// kernel: tpu_custom_call.1
= control target key start
LH: loop header
LB: loop body
LE: loop exit
PB: predicated region body
PF: predicated region fallthrough
CT: control target
= control target key end

     0   :  { %s4368_s0 = inlined_call_operand.hbm [shape: s32[8], index: 0, kind: input, shape index: {}]   ;;  %s4369_s1 = inlined_call_operand.hbm [shape: f32[32,128], index: 1, kind: input, shape index: {}]   ;;  %s4370_s2 = inlined_call_operand.vmem [shape: f32[1,128], index: 2, kind: input, shape index: {}]   ;;  %s4371_s3 = inlined_call_operand.hbm [shape: f32[128,384], index: 3, kind: input, shape index: {}]   ;;  %s4372_s4 = inlined_call_operand.vmem [shape: f32[1,384], index: 4, kind: input, shape index: {}]   ;;  %s4373_s5 = inlined_call_operand.hbm [shape: f32[128,384], index: 5, kind: input, shape index: {}]   ;;  %s4374_s6 = inlined_call_operand.vmem [shape: f32[1,384], index: 6, kind: input, shape index: {}]   ;;  %s4375_s7 = inlined_call_operand.hbm [shape: f32[128,128], index: 7, kind: input, shape index: {}]   ;;  %s4376_s8 = inlined_call_operand.vmem [shape: f32[1,128], index: 8, kind: input, shape index: {}]   ;;  %s4377_s9 = inlined_call_operand.hbm [shape: f32[8,128], index: 9, kind: output, shape index: {0}]   ;;  %s4378_s10 = inlined_call_operand.hbm [shape: f32[1,128], index: 10, kind: output, shape index: {1}]  }
   0x1   :  { %s3508_s15 = scalar_lea.hbm %s4368_s0, 16 }
   0x2   :  { %p3509_p0 = scmp.ne.s32.totalorder %s4368_s0, %s3508_s15  ;;  %p3512_p1 = scmp.lt.u32.totalorder %s3508_s15, %s4368_s0 }
   0x4   :  { %p3514_p2 = pnand %p3512_p1, %p3509_p0 }
   0x6   :  { %3517 = shalt.err (!%p3514_p2)  }
   0x7   :  { %s3662_s20 = smov [#allocation6]  }
   0x8   :  { %17 = dma.hbm_to_smem %s4368_s0, 16, %s3662_s20, [#allocation5] }
   0x9   :  { %3650 = dma.done.wait [#allocation5], 16 }
   0xa   :  { %3651 = vsyncadd [#allocation5], 4294967280 }
   0xb   :  { %19 = sfence }
   0xc   :  { %20 = vsyncpa [#allocation8], 0 }
   0xd   :  { %21 = vsyncpa [#allocation11], 0 }
   0xe   :  { %22 = vsyncpa [#allocation14], 0 }
   0xf   :  { %23 = vsyncpa [#allocation9], 0 }
  0x10   :  { %24 = vsyncpa [#allocation17], 0  ;;  %s3663_s23 = smov [#allocation10]   ;;  %s3518_s27 = scalar_lea.hbm %s4371_s3, 6144 }
  0x11   :  { %s44_s24 = sshll.u32 %s3663_s23, 4  ;;  %p3519_p3 = scmp.ne.s32.totalorder %s4371_s3, %s3518_s27  ;;  %s45_s24 = int_to_ptr.vmem [resolvable:$true] %s44_s24 }
  0x12   :  { %p3522_p4 = scmp.lt.u32.totalorder %s3518_s27, %s4371_s3 }
  0x14   :  { %p3524_p5 = pnand %p3522_p4, %p3519_p3 }
  0x16   :  { %3527 = shalt.err (!%p3524_p5)
}
  0x17   :  { %s3528_s11 = scalar_lea.vmem %s45_s24, 6144  ;;  %p3533_p7 = scmp.lt.s32.totalorder %s45_s24, %s45_s24 }
  0x18   :  { %p3529_p6 = scmp.ne.s32.totalorder %s45_s24, %s3528_s11  ;;  %p3534_p8 = scmp.lt.s32.totalorder %s3528_s11, %s3528_s11 }
  0x1a   :  { %p3535_p9 = por %p3534_p8, %p3533_p7 }
  0x1c   :  { %p3536_p10 = pnand %p3535_p9, %p3529_p6 }
  0x1e   :  { %3539 = shalt.err (!%p3536_p10)
}
  0x1f   :  { %s3664_s12 = smov 384   ;;  %s3665_s13 = smov 24  }
  0x20   :  { %50 = dma.hbm_to_vmem [thread:$0]  %s4371_s3, 6144, %s45_s24, [#allocation11], %s3664_s12, %s3664_s12, %s3665_s13  }
  0x21   :  { %s3666_s16 = smov [#allocation7]   ;;  %s3540_s20 = scalar_lea.hbm %s4369_s1, 512 }
  0x22   :  { %s30_s17 = sshll.u32 %s3666_s16, 4  ;;  %p3541_p11 = scmp.ne.s32.totalorder %s4369_s1, %s3540_s20  ;;  %s31_s17 = int_to_ptr.vmem [resolvable:$true] %s30_s17 }
  0x23   :  { %p3544_p12 = scmp.lt.u32.totalorder %s3540_s20, %s4369_s1 }
  0x25   :  { %p3546_p13 = pnand %p3544_p12, %p3541_p11 }
  0x27   :  { %3549 = shalt.err (!%p3546_p13)
}
  0x28   :  { %s3550_s26 = scalar_lea.vmem %s31_s17, 512  ;;  %p3555_p1 = scmp.lt.s32.totalorder %s31_s17, %s31_s17 }
  0x29   :  { %p3551_p0 = scmp.ne.s32.totalorder %s31_s17, %s3550_s26  ;;  %p3556_p2 = scmp.lt.s32.totalorder %s3550_s26, %s3550_s26 }
  0x2b   :  { %p3557_p3 = por %p3556_p2, %p3555_p1 }
  0x2d   :  { %p3558_p4 = pnand %p3557_p3, %p3551_p0 }
  0x2f   :  { %3561 = shalt.err (!%p3558_p4)
}
  0x30   :  { %s3667_s3 = smov 128   ;;  %s3668_s24 = smov 8  }
  0x31   :  { %36 = dma.hbm_to_vmem [thread:$0]  %s4369_s1, 512, %s31_s17, [#allocation8], %s3667_s3, %s3667_s3, %s3668_s24  }
  0x32   :  { %s3669_s29 = smov [#allocation12]   ;;  %s3670_s30 = smov [#allocation13]  }
  0x33   :  { %s58_s0 = sshll.u32 %s3669_s29, 4  ;;  %s72_s11 = sshll.u32 %s3670_s30, 4  ;;  %s59_s0 = int_to_ptr.vmem [resolvable:$true] %s58_s0  ;;  %s3773_s11 = int_to_ptr.vmem [resolvable:$true] %s72_s11 }
  0x34   :  { %s3562_s16 = scalar_lea.hbm %s4373_s5, 6144 }
  0x35   :  { %p3563_p5 = scmp.ne.s32.totalorder %s4373_s5, %s3562_s16  ;;  %p3566_p6 = scmp.lt.u32.totalorder %s3562_s16, %s4373_s5 }
  0x37   :  { %p3568_p7 = pnand %p3566_p6, %p3563_p5 }
  0x39   :  { %3571 = shalt.err (!%p3568_p7)
}
  0x3a   :  { %s3572_s1 = scalar_lea.vmem %s59_s0, 6144  ;;  %p3577_p9 = scmp.lt.s32.totalorder %s59_s0, %s59_s0 }
  0x3b   :  { %p3573_p8 = scmp.ne.s32.totalorder %s59_s0, %s3572_s1  ;;  %p3578_p10 = scmp.lt.s32.totalorder %s3572_s1, %s3572_s1 }
  0x3d   :  { %p3579_p11 = por %p3578_p10, %p3577_p9 }
  0x3f   :  { %p3580_p12 = pnand %p3579_p11, %p3573_p8 }
  0x41   :  { %3583 = shalt.err (!%p3580_p12)
}
  0x42   :  { %64 = dma.hbm_to_vmem [thread:$0]  %s4373_s5, 6144, %s59_s0, [#allocation11], %s3664_s12, %s3664_s12, %s3665_s13  }
  0x43   :  { %s3584_s26 = scalar_lea.hbm %s4375_s7, 2048 }
  0x44   :  { %p3585_p13 = scmp.ne.s32.totalorder %s4375_s7, %s3584_s26  ;;  %p3588_p0 = scmp.lt.u32.totalorder %s3584_s26, %s4375_s7 }
  0x46   :  { %p3590_p1 = pnand %p3588_p0, %p3585_p13 }
  0x48   :  { %3593 = shalt.err (!%p3590_p1)
}
  0x49   :  { %s3594_s14 = scalar_lea.vmem %s3773_s11, 2048  ;;  %p3599_p3 = scmp.lt.s32.totalorder %s3773_s11, %s3773_s11 }
  0x4a   :  { %p3595_p2 = scmp.ne.s32.totalorder %s3773_s11, %s3594_s14  ;;  %p3600_p4 = scmp.lt.s32.totalorder %s3594_s14, %s3594_s14 }
  0x4c   :  { %p3601_p5 = por %p3600_p4, %p3599_p3 }
  0x4e   :  { %p3602_p6 = pnand %p3601_p5, %p3595_p2 }
  0x50   :  { %3605 = shalt.err (!%p3602_p6)
}
  0x51   :  { %78 = dma.hbm_to_vmem [thread:$0]  %s4375_s7, 2048, %s3773_s11, [#allocation14], %s3667_s3, %s3667_s3, %s3668_s24  }
  0x52   :  { %3652 = dma.done.wait [#allocation8], 512  }
  0x53   :  { %3653 = vsyncadd [#allocation8], 4294966784 }
  0x54   :  { %3654 = dma.done.wait [#allocation11], 12288  }
  0x55   :  { %3655 = vsyncadd [#allocation11], 4294955008 }
  0x56   :  { %3656 = dma.done.wait [#allocation14], 2048  }
  0x57   :  { %3657 = vsyncadd [#allocation14], 4294965248  ;;  %v3671_v0 = vmov 0.0|0.0   ;;  %v3672_v1 = vmov 0.0   ;;  %vm3673_vm0 = vmmov 0   ;;  %v127_v2 = vld [vmem:[#allocation10 + $0x8] sm:$0xff] }
  0x58   :  { %2918 = vmatprep.subr.bf16.mxu1 %v3671_v0  ;;  %255 = vmatprep.mubr.f32.mxu0 %v3672_v1  ;;  %v130_v3 = vld [vmem:[#allocation10 + $0x20] sm:$0xff]  ;;  %v129_v6 = vld [vmem:[#allocation10 + $0x18] sm:$0xff]  ;;  %v128_v7 = vld [vmem:[#allocation10 + $0x10] sm:$0xff]  ;;  %s3814_s7 = sld [smem:[#allocation6]]  ;;  %s3816_s13 = sld [smem:[#allocation6 + $0x1]] }
  0x59   :  { %2568 = vmatprep.mubr.msk.f32.mxu1 %vm3673_vm0, %v3672_v1  ;;  %v126_v4 = vld [vmem:[#allocation10] sm:$0xff]  ;;  %v2886_v5 = vpack.c.bf16 %v130_v3, %v127_v2  ;;  %v131_v8 = vld [vmem:[#allocation10 + $0x28] sm:$0xff]  ;;  %v133_v11 = vld [vmem:[#allocation10 + $0x38] sm:$0xff]  ;;  %s3818_s3 = sld [smem:[#allocation6 + $0x2]]  ;;  %s3821_s24 = sld [smem:[#allocation6 + $0x3]] }
  0x5a   :  { %v2888_v9 = vpack.c.bf16 %v129_v6, %v126_v4  ;;  %v2919_v10 = vpack.c.bf16 %v131_v8, %v128_v7  ;;  %v136_v12 = vld [vmem:[#allocation10 + $0x50] sm:$0xff]  ;;  %v135_v15 = vld [vmem:[#allocation10 + $0x48] sm:$0xff]  ;;  %v134_v16 = vld [vmem:[#allocation10 + $0x40] sm:$0xff]  ;;  %s3823_s0 = sld [smem:[#allocation6 + $0x4]]  ;;  %s3825_s11 = sld [smem:[#allocation6 + $0x5]] }
  0x5b   :  { %v132_v13 = vld [vmem:[#allocation10 + $0x30] sm:$0xff]  ;;  %2887 = vmatprep.subr.bf16.mxu0 %v2886_v5  ;;  %v2890_v14 = vpack.c.bf16 %v136_v12, %v133_v11  ;;  %v137_v17 = vld [vmem:[#allocation10 + $0x58] sm:$0xff]  ;;  %v139_v20 = vld [vmem:[#allocation10 + $0x68] sm:$0xff]  ;;  %s3827_s15 = sld [smem:[#allocation6 + $0x6]]  ;;  %s3829_s16 = sld [smem:[#allocation6 + $0x7]] }
  0x5c   :  { %2889 = vmatpush1.bf16.msra.mxu0 %v2888_v9  ;;  %2920 = vmatpush3.bf16.msra.mxu1 %v2919_v10  ;;  %v2892_v18 = vpack.c.bf16 %v135_v15, %v132_v13  ;;  %v2922_v19 = vpack.c.bf16 %v137_v17, %v134_v16  ;;  %v142_v21 = vld [vmem:[#allocation10 + $0x80] sm:$0xff]  ;;  %v141_v24 = vld [vmem:[#allocation10 + $0x78] sm:$0xff]  ;;  %v140_v25 = vld [vmem:[#allocation10 + $0x70] sm:$0xff] }
  0x5d   :  { %v138_v22 = vld [vmem:[#allocation10 + $0x60] sm:$0xff]  ;;  %2891 = vmatprep.subr.bf16.mxu0 %v2890_v14  ;;  %2921 = vmatprep.subr.bf16.mxu1 %v3671_v0  ;;  %v2894_v23 = vpack.c.bf16 %v142_v21, %v139_v20  ;;  %v143_v26 = vld [vmem:[#allocation10 + $0x88] sm:$0xff]  ;;  %v145_v27 = vld [vmem:[#allocation10 + $0x98] sm:$0xff] }
  0x5e   :  { %v148_v28 = vld [vmem:[#allocation10 + $0xb0] sm:$0xff]  ;;  %v2896_v29 = vpack.c.bf16 %v141_v24, %v138_v22  ;;  %v2925_v30 = vpack.c.bf16 %v143_v26, %v140_v25  ;;  %v147_v33 = vld [vmem:[#allocation10 + $0xa8] sm:$0xff]  ;;  %v146_v34 = vld [vmem:[#allocation10 + $0xa0] sm:$0xff]  ;;  %s94_s18 = scalar_lea.vmem [#allocation7], %s3814_s7  ;;  %s98_s19 = scalar_lea.vmem [#allocation7], %s3816_s13 }
  0x5f   :  { %v144_v31 = vld [vmem:[#allocation10 + $0x90] sm:$0xff]  ;;  %v2898_v32 = vpack.c.bf16 %v148_v28, %v145_v27  ;;  %v149_v35 = vld [vmem:[#allocation10 + $0xb8] sm:$0xff]  ;;  %v151_v36 = vld [vmem:[#allocation10 + $0xc8] sm:$0xff]  ;;  %s102_s20 = scalar_lea.vmem [#allocation7], %s3818_s3  ;;  %s106_s21 = scalar_lea.vmem [#allocation7], %s3821_s24 }
  0x60   :  { %2893 = vmatpush1.bf16.msra.mxu0 %v2892_v18  ;;  %2923 = vmatpush3.bf16.msra.mxu1 %v2922_v19  ;;  %v154_v37 = vld [vmem:[#allocation10 + $0xe0] sm:$0xff]  ;;  %v2900_v38 = vpack.c.bf16 %v147_v33, %v144_v31  ;;  %v2928_v39 = vpack.c.bf16 %v149_v35, %v146_v34  ;;  %v153_v42 = vld [vmem:[#allocation10 + $0xd8] sm:$0xff]  ;;  %v152_v43 = vld [vmem:[#allocation10 + $0xd0] sm:$0xff]  ;;  %s110_s1 = scalar_lea.vmem [#allocation7], %s3823_s0  ;;  %s114_s17 = scalar_lea.vmem [#allocation7], %s3825_s11 }
  0x61   :  { %2895 = vmatprep.subr.bf16.mxu0 %v2894_v23  ;;  %2924 = vmatprep.subr.bf16.mxu1 %v3671_v0  ;;  %v150_v40 = vld [vmem:[#allocation10 + $0xc0] sm:$0xff]  ;;  %v2902_v41 = vpack.c.bf16 %v154_v37, %v151_v36  ;;  %v155_v44 = vld [vmem:[#allocation10 + $0xe8] sm:$0xff]  ;;  %v157_v45 = vld [vmem:[#allocation10 + $0xf8] sm:$0xff]  ;;  %s118_s22 = scalar_lea.vmem [#allocation7], %s3827_s15  ;;  %s122_s23 = scalar_lea.vmem [#allocation7], %s3829_s16 }
  0x62   :  { %v160_v46 = vld [vmem:[#allocation10 + $0x110] sm:$0xff]  ;;  %v159_v48 = vld [vmem:[#allocation10 + $0x108] sm:$0xff]  ;;  %v158_v49 = vld [vmem:[#allocation10 + $0x100] sm:$0xff]  ;;  %v2904_v51 = vpack.c.bf16 %v153_v42, %v150_v40  ;;  %v2931_v52 = vpack.c.bf16 %v155_v44, %v152_v43 }
  0x63   :  { %v156_v47 = vld [vmem:[#allocation10 + $0xf0] sm:$0xff]  ;;  %v161_v50 = vld [vmem:[#allocation10 + $0x118] sm:$0xff]  ;;  %v163_v53 = vld [vmem:[#allocation10 + $0x128] sm:$0xff]  ;;  %v2906_v57 = vpack.c.bf16 %v160_v46, %v157_v45 }
  0x64   :  { %2897 = vmatpush1.bf16.msra.mxu0 %v2896_v29  ;;  %2926 = vmatpush3.bf16.msra.mxu1 %v2925_v30  ;;  %v95_v54 = vld [vmem:[%s94_s18] sm:$0x1]  ;;  %v166_v61 = vld [vmem:[#allocation10 + $0x140] sm:$0xff]  ;;  %v2908_v2 = vpack.c.bf16 %v159_v48, %v156_v47  ;;  %v2934_v3 = vpack.c.bf16 %v161_v50, %v158_v49  ;;  %v165_v6 = vld [vmem:[#allocation10 + $0x138] sm:$0xff] }
  0x65   :  { %2899 = vmatprep.subr.bf16.mxu0 %v2898_v32  ;;  %2927 = vmatprep.subr.bf16.mxu1 %v3671_v0  ;;  %v99_v55 = vld [vmem:[%s98_s19] sm:$0x1]  ;;  %96 = vst [vmem:[#allocation2] sm:$0x1] %v95_v54  ;;  %v162_v4 = vld [vmem:[#allocation10 + $0x120] sm:$0xff]  ;;  %v2910_v5 = vpack.c.bf16 %v166_v61, %v163_v53  ;;  %v164_v7 = vld [vmem:[#allocation10 + $0x130] sm:$0xff] }
  0x66   :  { %v103_v56 = vld [vmem:[%s102_s20] sm:$0x1]  ;;  %100 = vst [vmem:[#allocation2 + $0x1] sm:$0x1] %v99_v55  ;;  %v169_v9 = vld [vmem:[#allocation10 + $0x158] sm:$0xff]  ;;  %v172_v10 = vld [vmem:[#allocation10 + $0x170] sm:$0xff]  ;;  %v2912_v11 = vpack.c.bf16 %v165_v6, %v162_v4 }
  0x67   :  { %104 = vst [vmem:[#allocation2 + $0x2] sm:$0x1] %v103_v56  ;;  %v107_v58 = vld [vmem:[%s106_s21] sm:$0x1]  ;;  %v168_v13 = vld [vmem:[#allocation10 + $0x150] sm:$0xff]  ;;  %v2914_v14 = vpack.c.bf16 %v172_v10, %v169_v9  ;;  %v170_v16 = vld [vmem:[#allocation10 + $0x160] sm:$0xff] }
  0x68   :  { %2901 = vmatpush1.bf16.msra.mxu0 %v2900_v38  ;;  %2929 = vmatpush3.bf16.msra.mxu1 %v2928_v39  ;;  %v111_v59 = vld [vmem:[%s110_s1] sm:$0x1]  ;;  %108 = vst [vmem:[#allocation2 + $0x3] sm:$0x1] %v107_v58  ;;  %v173_v17 = vld [vmem:[#allocation10 + $0x178] sm:$0xff]  ;;  %v340_v19 = vld [vmem:[#allocation12 + $0x20] sm:$0xff] }
  0x69   :  { %2903 = vmatprep.subr.bf16.mxu0 %v2902_v41  ;;  %2930 = vmatprep.subr.bf16.mxu1 %v3671_v0  ;;  %v115_v60 = vld [vmem:[%s114_s17] sm:$0x1]  ;;  %112 = vst [vmem:[#allocation2 + $0x4] sm:$0x1] %v111_v59  ;;  %v2940_v21 = vpack.c.bf16 %v173_v17, %v170_v16  ;;  %v336_v22 = vld [vmem:[#allocation12] sm:$0xff]  ;;  %v339_v24 = vld [vmem:[#allocation12 + $0x18] sm:$0xff] }
  0x6a   :  { %116 = vst [vmem:[#allocation2 + $0x5] sm:$0x1] %v115_v60  ;;  %v119_v62 = vld [vmem:[%s118_s22] sm:$0x1]  ;;  %v338_v25 = vld [vmem:[#allocation12 + $0x10] sm:$0xff]  ;;  %v343_v27 = vld [vmem:[#allocation12 + $0x38] sm:$0xff]  ;;  %v3847_v30 = vpack.c.bf16 %v339_v24, %v336_v22 }
  0x6b   :  { %v123_v63 = vld [vmem:[%s122_s23] sm:$0x1]  ;;  %120 = vst [vmem:[#allocation2 + $0x6] sm:$0x1] %v119_v62  ;;  %v346_v28 = vld [vmem:[#allocation12 + $0x50] sm:$0xff]  ;;  %v344_v35 = vld [vmem:[#allocation12 + $0x40] sm:$0xff] }
  0x6c   :  { %124 = vst [vmem:[#allocation2 + $0x7] sm:$0x1] %v123_v63  ;;  %2905 = vmatpush1.bf16.msra.mxu0 %v2904_v51  ;;  %2932 = vmatpush3.bf16.msra.mxu1 %v2931_v52  ;;  %v167_v8 = vld [vmem:[#allocation10 + $0x148] sm:$0xff]  ;;  %v342_v31 = vld [vmem:[#allocation12 + $0x30] sm:$0xff]  ;;  %v3852_v33 = vpack.c.bf16 %v346_v28, %v343_v27  ;;  %v347_v36 = vld [vmem:[#allocation12 + $0x58] sm:$0xff] }
  0x6d   :  { %2907 = vmatprep.subr.bf16.mxu0 %v2906_v57  ;;  %2933 = vmatprep.subr.bf16.mxu1 %v3671_v0  ;;  %v2937_v12 = vpack.c.bf16 %v167_v8, %v164_v7  ;;  %v171_v15 = vld [vmem:[#allocation10 + $0x168] sm:$0xff]  ;;  %v352_v38 = vld [vmem:[#allocation12 + $0x80] sm:$0xff]  ;;  %v3859_v41 = vpack.c.bf16 %v347_v36, %v344_v35  ;;  %v351_v43 = vld [vmem:[#allocation12 + $0x78] sm:$0xff]  ;;  %v176_v36 = vlaneseq }
  0x6e   :  { %v337_v18 = vld [vmem:[#allocation12 + $0x8] sm:$0xff]  ;;  %v2916_v20 = vpack.c.bf16 %v171_v15, %v168_v13  ;;  %v348_v40 = vld [vmem:[#allocation12 + $0x60] sm:$0xff]  ;;  %v350_v44 = vld [vmem:[#allocation12 + $0x70] sm:$0xff] }
  0x6f   :  { %v3845_v23 = vpack.c.bf16 %v340_v19, %v337_v18  ;;  %v341_v26 = vld [vmem:[#allocation12 + $0x28] sm:$0xff]  ;;  %v355_v46 = vld [vmem:[#allocation12 + $0x98] sm:$0xff]  ;;  %v358_v47 = vld [vmem:[#allocation12 + $0xb0] sm:$0xff]  ;;  %v3869_v48 = vpack.c.bf16 %v351_v43, %v348_v40 }
  0x70   :  { %2909 = vmatpush1.bf16.msra.mxu0 %v2908_v2  ;;  %2935 = vmatpush3.bf16.msra.mxu1 %v2934_v3  ;;  %v3849_v32 = vpack.c.bf16 %v341_v26, %v338_v25  ;;  %v345_v34 = vld [vmem:[#allocation12 + $0x48] sm:$0xff]  ;;  %v354_v49 = vld [vmem:[#allocation12 + $0x90] sm:$0xff]  ;;  %v3875_v51 = vpack.c.bf16 %v358_v47, %v355_v46  ;;  %v356_v53 = vld [vmem:[#allocation12 + $0xa0] sm:$0xff] }
  0x71   :  { %2911 = vmatprep.subr.bf16.mxu0 %v2910_v5  ;;  %2936 = vmatprep.subr.bf16.mxu1 %v3671_v0  ;;  %v349_v37 = vld [vmem:[#allocation12 + $0x68] sm:$0xff]  ;;  %v3856_v39 = vpack.c.bf16 %v345_v34, %v342_v31  ;;  %v359_v54 = vld [vmem:[#allocation12 + $0xb8] sm:$0xff]  ;;  %v364_v56 = vld [vmem:[#allocation12 + $0xe0] sm:$0xff] }
  0x72   :  { %v3862_v42 = vpack.c.bf16 %v352_v38, %v349_v37  ;;  %v353_v45 = vld [vmem:[#allocation12 + $0x88] sm:$0xff]  ;;  %v360_v58 = vld [vmem:[#allocation12 + $0xc0] sm:$0xff]  ;;  %v3882_v59 = vpack.c.bf16 %v359_v54, %v356_v53  ;;  %v363_v61 = vld [vmem:[#allocation12 + $0xd8] sm:$0xff]  ;;  %v177_v37 = vshrl.u32 %v176_v36, 7 }
  0x73   :  { %v125_v29 = vld [vmem:[#allocation2] sm:$0xff]  ;;  %v3872_v50 = vpack.c.bf16 %v353_v45, %v350_v44  ;;  %v357_v52 = vld [vmem:[#allocation12 + $0xa8] sm:$0xff]  ;;  %v362_v62 = vld [vmem:[#allocation12 + $0xd0] sm:$0xff]  ;;  %v3889_v4 = vpack.c.bf16 %v363_v61, %v360_v58 }
  0x74   :  { %2913 = vmatpush1.bf16.msra.mxu0 %v2912_v11  ;;  %2938 = vmatpush3.bf16.msra.mxu1 %v2937_v12  ;;  %v361_v55 = vld [vmem:[#allocation12 + $0xc8] sm:$0xff]  ;;  %v3879_v57 = vpack.c.bf16 %v357_v52, %v354_v49  ;;  %v367_v2 = vld [vmem:[#allocation12 + $0xf8] sm:$0xff]  ;;  %v370_v3 = vld [vmem:[#allocation12 + $0x110] sm:$0xff]  ;;  %v3972_v38 = vsub.s32 0, %v177_v37  ;;  %v3974_v40 = vsub.s32 2, %v177_v37  ;;  %v3979_v44 = vsub.s32 1, %v177_v37 }
  0x75   :  { %2915 = vmatprep.subr.bf16.mxu0 %v2914_v14  ;;  %2939 = vmatprep.subr.bf16.mxu1 %v3671_v0  ;;  %v3885_v60 = vpack.c.bf16 %v364_v56, %v361_v55  ;;  %v365_v63 = vld [vmem:[#allocation12 + $0xe8] sm:$0xff]  ;;  %v366_v5 = vld [vmem:[#allocation12 + $0xf0] sm:$0xff]  ;;  %v3895_v7 = vpack.c.bf16 %v370_v3, %v367_v2  ;;  %v368_v9 = vld [vmem:[#allocation12 + $0x100] sm:$0xff] }
  0x76   :  { %v3892_v6 = vpack.c.bf16 %v365_v63, %v362_v62  ;;  %v369_v8 = vld [vmem:[#allocation12 + $0x108] sm:$0xff]  ;;  %v371_v10 = vld [vmem:[#allocation12 + $0x118] sm:$0xff]  ;;  %v376_v12 = vld [vmem:[#allocation12 + $0x140] sm:$0xff] }
  0x77   :  { %v373_v11 = vld [vmem:[#allocation12 + $0x128] sm:$0xff]  ;;  %v3899_v13 = vpack.c.bf16 %v369_v8, %v366_v5  ;;  %v372_v14 = vld [vmem:[#allocation12 + $0x120] sm:$0xff]  ;;  %v3902_v15 = vpack.c.bf16 %v371_v10, %v368_v9  ;;  %v375_v17 = vld [vmem:[#allocation12 + $0x138] sm:$0xff] }
  0x78   :  { %2917 = vmatpush1.bf16.msra.mxu0 %v2916_v20  ;;  %2941 = vmatpush3.bf16.msra.mxu1 %v2940_v21  ;;  %v3905_v16 = vpack.c.bf16 %v376_v12, %v373_v11  ;;  %v374_v18 = vld [vmem:[#allocation12 + $0x130] sm:$0xff]  ;;  %v377_v19 = vld [vmem:[#allocation12 + $0x148] sm:$0xff]  ;;  %v379_v20 = vld [vmem:[#allocation12 + $0x158] sm:$0xff]  ;;  %v3909_v22 = vpack.c.bf16 %v375_v17, %v372_v14 }
  0x79   :  { %2943 = vmatprep.subr.bf16.mxu0 %v3845_v23  ;;  %2974 = vmatprep.subr.bf16.mxu1 %v3671_v0  ;;  %v382_v21 = vld [vmem:[#allocation12 + $0x170] sm:$0xff]  ;;  %v3912_v25 = vpack.c.bf16 %v377_v19, %v374_v18  ;;  %v381_v27 = vld [vmem:[#allocation12 + $0x168] sm:$0xff]  ;;  %v380_v28 = vld [vmem:[#allocation12 + $0x160] sm:$0xff] }
  0x7a   :  { %v378_v24 = vld [vmem:[#allocation12 + $0x150] sm:$0xff]  ;;  %v3915_v26 = vpack.c.bf16 %v382_v21, %v379_v20  ;;  %v3930_v35 = vld [vmem:[%s4370_s2] sm:$0x1] }
  0x7b   :  { %256 = vmatmul.mubr.f32.vlgmr.msra.gmra.mrb[0].mxu0 %v125_v29  ;;  %2569 = vmatmul.mubr.f32.vlgmr.msra.gmra.mrb[0].mxu1 %v125_v29  ;;  %v383_v29 = vld [vmem:[#allocation12 + $0x178] sm:$0xff]  ;;  %v3919_v31 = vpack.c.bf16 %v381_v27, %v378_v24  ;;  %v174_v43 = vld [vmem:[%s4372_s4] sm:$0x7] }
  0x7c   :  { %2945 = vmatpush1.bf16.msra.mxu0 %v3847_v30  ;;  %2976 = vmatpush3.bf16.msra.mxu1 %v3849_v32  ;;  %v3922_v34 = vpack.c.bf16 %v383_v29, %v380_v28  ;;  %v179_v45 = vrot.slane %v174_v43, %v3972_v38  ;;  %v187_v46 = vrot.slane %v174_v43, %v3974_v40  ;;  %v384_v61 = vld [vmem:[%s4374_s6] sm:$0x7] }
  0x7d   :  { %2947 = vmatprep.subr.bf16.mxu0 %v3852_v33  ;;  %465 = vmatprep.mubr.f32.mxu0 %v3672_v1  ;;  %v183_v47 = vrot.slane %v174_v43, %v3979_v44  ;;  %v389_v62 = vrot.slane %v384_v61, %v3972_v38  ;;  %v393_v11 = vrot.slane %v384_v61, %v3979_v44 }
  0x7e   :  { %2977 = vmatprep.subr.bf16.mxu1 %v3671_v0  ;;  %2603 = vmatprep.mubr.msk.f32.mxu1 %vm3673_vm0, %v3672_v1  ;;  %v397_v24 = vrot.slane %v384_v61, %v3974_v40 }
  0x80   :  { %2949 = vmatpush1.bf16.msra.mxu0 %v3856_v39  ;;  %2979 = vmatpush3.bf16.msra.mxu1 %v3859_v41 }
  0x81   :  { %2951 = vmatprep.subr.bf16.mxu0 %v3862_v42  ;;  %2980 = vmatprep.subr.bf16.mxu1 %v3671_v0 }
  0x84   :  { %2953 = vmatpush1.bf16.msra.mxu0 %v3869_v48  ;;  %2982 = vmatpush3.bf16.msra.mxu1 %v3872_v50 }
  0x85   :  { %2955 = vmatprep.subr.bf16.mxu0 %v3875_v51  ;;  %2983 = vmatprep.subr.bf16.mxu1 %v3671_v0 }
  0x88   :  { %2957 = vmatpush1.bf16.msra.mxu0 %v3879_v57  ;;  %2985 = vmatpush3.bf16.msra.mxu1 %v3882_v59 }
  0x89   :  { %2959 = vmatprep.subr.bf16.mxu0 %v3885_v60  ;;  %2986 = vmatprep.subr.bf16.mxu1 %v3671_v0 }
  0x8c   :  { %2961 = vmatpush1.bf16.msra.mxu0 %v3889_v4  ;;  %2988 = vmatpush3.bf16.msra.mxu1 %v3892_v6 }
  0x8d   :  { %2963 = vmatprep.subr.bf16.mxu0 %v3895_v7  ;;  %2989 = vmatprep.subr.bf16.mxu1 %v3671_v0 }
  0x90   :  { %2965 = vmatpush1.bf16.msra.mxu0 %v3899_v13  ;;  %2991 = vmatpush3.bf16.msra.mxu1 %v3902_v15 }
  0x91   :  { %2967 = vmatprep.subr.bf16.mxu0 %v3905_v16  ;;  %2992 = vmatprep.subr.bf16.mxu1 %v3671_v0 }
  0x94   :  { %2969 = vmatpush1.bf16.msra.mxu0 %v3909_v22  ;;  %2994 = vmatpush3.bf16.msra.mxu1 %v3912_v25 }
  0x95   :  { %2971 = vmatprep.subr.bf16.mxu0 %v3915_v26  ;;  %2995 = vmatprep.subr.bf16.mxu1 %v3671_v0 }
  0x98   :  { %2973 = vmatpush1.bf16.msra.mxu0 %v3919_v31  ;;  %2997 = vmatpush3.bf16.msra.mxu1 %v3922_v34 }
  0x99   :  { %2999 = vmatprep.subr.bf16.mxu0 %v3845_v23  ;;  %3030 = vmatprep.subr.bf16.mxu1 %v3671_v0 }
  0x9b   :  { %466 = vmatmul.mubr.f32.vlgmr.msra.gmra.mrb[2].mxu0 %v3930_v35  ;;  %2604 = vmatmul.mubr.f32.vlgmr.msra.gmra.mrb[2].mxu1 %v3930_v35 }
  0x9c   :  { %3001 = vmatpush1.bf16.msra.mxu0 %v3847_v30  ;;  %3032 = vmatpush3.bf16.msra.mxu1 %v3849_v32 }
  0x9d   :  { %3003 = vmatprep.subr.bf16.mxu0 %v3852_v33  ;;  %3033 = vmatprep.subr.bf16.mxu1 %v3671_v0 }
  0x9e   :  { %698 = vmatprep.mubr.f32.mxu0 %v3672_v1  ;;  %2638 = vmatprep.mubr.msk.f32.mxu1 %vm3673_vm0, %v3672_v1 }
  0xa0   :  { %3005 = vmatpush1.bf16.msra.mxu0 %v3856_v39  ;;  %3035 = vmatpush3.bf16.msra.mxu1 %v3859_v41 }
  0xa1   :  { %3007 = vmatprep.subr.bf16.mxu0 %v3862_v42  ;;  %3036 = vmatprep.subr.bf16.mxu1 %v3671_v0 }
  0xa4   :  { %3009 = vmatpush1.bf16.msra.mxu0 %v3869_v48  ;;  %3038 = vmatpush3.bf16.msra.mxu1 %v3872_v50 }
  0xa5   :  { %3011 = vmatprep.subr.bf16.mxu0 %v3875_v51  ;;  %3039 = vmatprep.subr.bf16.mxu1 %v3671_v0 }
  0xa8   :  { %3013 = vmatpush1.bf16.msra.mxu0 %v3879_v57  ;;  %3041 = vmatpush3.bf16.msra.mxu1 %v3882_v59 }
  0xa9   :  { %3015 = vmatprep.subr.bf16.mxu0 %v3885_v60  ;;  %3042 = vmatprep.subr.bf16.mxu1 %v3671_v0 }
  0xac   :  { %3017 = vmatpush1.bf16.msra.mxu0 %v3889_v4  ;;  %3044 = vmatpush3.bf16.msra.mxu1 %v3892_v6 }
  0xad   :  { %3019 = vmatprep.subr.bf16.mxu0 %v3895_v7  ;;  %3045 = vmatprep.subr.bf16.mxu1 %v3671_v0 }
  0xb0   :  { %3021 = vmatpush1.bf16.msra.mxu0 %v3899_v13  ;;  %3047 = vmatpush3.bf16.msra.mxu1 %v3902_v15 }
  0xb1   :  { %3023 = vmatprep.subr.bf16.mxu0 %v3905_v16  ;;  %3048 = vmatprep.subr.bf16.mxu1 %v3671_v0 }
  0xb4   :  { %3025 = vmatpush1.bf16.msra.mxu0 %v3909_v22  ;;  %3050 = vmatpush3.bf16.msra.mxu1 %v3912_v25 }
  0xb5   :  { %3027 = vmatprep.subr.bf16.mxu0 %v3915_v26  ;;  %3051 = vmatprep.subr.bf16.mxu1 %v3671_v0 }
  0xb8   :  { %3029 = vmatpush1.bf16.msra.mxu0 %v3919_v31  ;;  %3053 = vmatpush3.bf16.msra.mxu1 %v3922_v34 }
  0xb9   :  { %3055 = vmatprep.subr.bf16.mxu0 %v3845_v23  ;;  %3086 = vmatprep.subr.bf16.mxu1 %v3671_v0 }
 0x14e   :  { %v257_v49 = vpop.f32.mrb[0].mxu0  ;;  %v328_v52 = vpop.f32.mrb[0].mxu1 }
 0x14f   :  { %v258_v53 = vadd.f32 %v257_v49, %v179_v45  ;;  %v259_v54 = vpop.f32.mrb[1].mxu0  ;;  %v329_v55 = vadd.f32 %v328_v52, %v187_v46  ;;  %v2570_v56 = vpop.f32.mrb[1].mxu1 }
 0x150   :  { %v260_v58 = vadd.f32 %v259_v54, %v183_v47 }
 0x151   :  { %332 = vst [vmem:[#allocation3] sm:$0xff] %v258_v53  ;;  %334 = vst [vmem:[#allocation3 + $0x10] sm:$0xff] %v329_v55 }
 0x152   :  { %333 = vst [vmem:[#allocation3 + $0x8] sm:$0xff] %v260_v58 }
 0x159   :  { %v542_v9 = vld [vmem:[#allocation3] ss:$8 sm:$0x7] }
 0x15a   :  { %v551_v17 = vrot.slane %v542_v9, 1  ;;  %v561_v37 = vrot.slane %v542_v9, 2 }
 0x16e   :  { %v467_v63 = vpop.f32.mrb[2].mxu0  ;;  %v538_v2 = vpop.f32.mrb[2].mxu1 }
 0x16f   :  { %v468_v3 = vadd.f32 %v467_v63, %v389_v62  ;;  %v469_v5 = vpop.f32.mrb[3].mxu0  ;;  %v2605_v8 = vpop.f32.mrb[3].mxu1  ;;  %v539_v27 = vadd.f32 %v538_v2, %v397_v24  ;;  %v776_v63 = vld [vmem:[#allocation3 + $0x1] ss:$8 sm:$0x7] }
 0x170   :  { %v470_v14 = vadd.f32 %v469_v5, %v393_v11  ;;  %v785_v8 = vrot.slane %v776_v63, 1 }
 0x171   :  { %v543_v10 = vadd.f32 %v542_v9, %v468_v3 }
 0x172   :  { %v553_v18 = vadd.f32 %v551_v17, %v470_v14 }
 0x173   :  { %v2349_v12 = vmul.f32 -1.442695, %v543_v10 }
 0x174   :  { %v2350_v19 = vmul.f32 -1.442695, %v553_v18 }
 0x175   :  { %3428 = vpow2.f32 %v2349_v12 }
 0x176   :  { %3430 = vpow2.f32 %v2350_v19 }
 0x17f   :  { %v3429_v20 = vpop.eup %3428 }
 0x180   :  { %v547_v21 = vadd.f32 1.0, %v3429_v20  ;;  %v3431_v28 = vpop.eup %3430 }
 0x181   :  { %v557_v43 = vadd.f32 1.0, %v3431_v28 }
 0x182   :  { %3432 = vrcp.f32 %v547_v21  ;;  %v795_v21 = vrot.slane %v776_v63, 2 }
 0x18c   :  { %v3433_v29 = vpop.eup %3432 }
 0x18d   :  { %v560_v36 = vmul.f32 %v3433_v29, %v539_v27 }
 0x18f   :  { %v563_v45 = vadd.f32 %v561_v37, %v560_v36 }
 0x191   :  { %3434 = vtanh.f32 %v563_v45 }
 0x192   :  { %3436 = vrcp.f32 %v557_v43 }
 0x19b   :  { %v3435_v46 = vpop.eup %3434 }
 0x19c   :  { %v565_v47 = vsub.f32 %v3930_v35, %v3435_v46  ;;  %v3437_v49 = vpop.eup %3436  ;;  %v617_v35 = vld [vmem:[%s4374_s6] sm:$0x7] }
 0x19d   :  { %v622_v54 = vrot.slane %v617_v35, %v3972_v38  ;;  %v626_v3 = vrot.slane %v617_v35, %v3979_v44  ;;  %v630_v14 = vrot.slane %v617_v35, %v3974_v40 }
 0x19e   :  { %v566_v52 = vmul.f32 %v3437_v49, %v565_v47 }
 0x1a0   :  { %v3991_v53 = vadd.f32 %v3435_v46, %v566_v52 }
 0x1a2   :  { %568 = vst [vmem:[#allocation4] sm:$0x1] %v3991_v53  ;;  %699 = vmatmul.mubr.f32.vlgmr.msra.gmra.mrb[4].mxu0 %v3991_v53  ;;  %2639 = vmatmul.mubr.f32.vlgmr.msra.gmra.mrb[4].mxu1 %v3991_v53 }
 0x1a3   :  { %3057 = vmatpush1.bf16.msra.mxu0 %v3847_v30  ;;  %3088 = vmatpush3.bf16.msra.mxu1 %v3849_v32 }
 0x1a4   :  { %3059 = vmatprep.subr.bf16.mxu0 %v3852_v33  ;;  %3089 = vmatprep.subr.bf16.mxu1 %v3671_v0 }
 0x1a5   :  { %932 = vmatprep.mubr.f32.mxu0 %v3672_v1  ;;  %2673 = vmatprep.mubr.msk.f32.mxu1 %vm3673_vm0, %v3672_v1 }
 0x1a7   :  { %3061 = vmatpush1.bf16.msra.mxu0 %v3856_v39  ;;  %3091 = vmatpush3.bf16.msra.mxu1 %v3859_v41 }
 0x1a8   :  { %3063 = vmatprep.subr.bf16.mxu0 %v3862_v42  ;;  %3092 = vmatprep.subr.bf16.mxu1 %v3671_v0 }
 0x1ab   :  { %3065 = vmatpush1.bf16.msra.mxu0 %v3869_v48  ;;  %3094 = vmatpush3.bf16.msra.mxu1 %v3872_v50 }
 0x1ac   :  { %3067 = vmatprep.subr.bf16.mxu0 %v3875_v51  ;;  %3095 = vmatprep.subr.bf16.mxu1 %v3671_v0 }
 0x1af   :  { %3069 = vmatpush1.bf16.msra.mxu0 %v3879_v57  ;;  %3097 = vmatpush3.bf16.msra.mxu1 %v3882_v59 }
 0x1b0   :  { %3071 = vmatprep.subr.bf16.mxu0 %v3885_v60  ;;  %3098 = vmatprep.subr.bf16.mxu1 %v3671_v0 }
 0x1b3   :  { %3073 = vmatpush1.bf16.msra.mxu0 %v3889_v4  ;;  %3100 = vmatpush3.bf16.msra.mxu1 %v3892_v6 }
 0x1b4   :  { %3075 = vmatprep.subr.bf16.mxu0 %v3895_v7  ;;  %3101 = vmatprep.subr.bf16.mxu1 %v3671_v0 }
 0x1b7   :  { %3077 = vmatpush1.bf16.msra.mxu0 %v3899_v13  ;;  %3103 = vmatpush3.bf16.msra.mxu1 %v3902_v15 }
 0x1b8   :  { %3079 = vmatprep.subr.bf16.mxu0 %v3905_v16  ;;  %3104 = vmatprep.subr.bf16.mxu1 %v3671_v0 }
 0x1bb   :  { %3081 = vmatpush1.bf16.msra.mxu0 %v3909_v22  ;;  %3106 = vmatpush3.bf16.msra.mxu1 %v3912_v25 }
 0x1bc   :  { %3083 = vmatprep.subr.bf16.mxu0 %v3915_v26  ;;  %3107 = vmatprep.subr.bf16.mxu1 %v3671_v0 }
 0x1bf   :  { %3085 = vmatpush1.bf16.msra.mxu0 %v3919_v31  ;;  %3109 = vmatpush3.bf16.msra.mxu1 %v3922_v34 }
 0x1c0   :  { %3111 = vmatprep.subr.bf16.mxu0 %v3845_v23  ;;  %3142 = vmatprep.subr.bf16.mxu1 %v3671_v0 }
 0x275   :  { %v700_v55 = vpop.f32.mrb[4].mxu0  ;;  %v771_v56 = vpop.f32.mrb[4].mxu1 }
 0x276   :  { %v701_v58 = vadd.f32 %v700_v55, %v622_v54  ;;  %v702_v61 = vpop.f32.mrb[5].mxu0  ;;  %v2640_v62 = vpop.f32.mrb[5].mxu1  ;;  %v772_v18 = vadd.f32 %v771_v56, %v630_v14  ;;  %v1272_v54 = vld [vmem:[#allocation12 + $0x8] sm:$0xff]  ;;  %v1275_v55 = vld [vmem:[#allocation12 + $0x20] sm:$0xff]  ;;  %v1282_v14 = vld [vmem:[#allocation12 + $0x58] sm:$0xff] }
 0x277   :  { %v703_v23 = vadd.f32 %v702_v61, %v626_v3  ;;  %v4092_v56 = vpack.c.bf16 %v1275_v55, %v1272_v54  ;;  %v1274_v61 = vld [vmem:[#allocation12 + $0x18] sm:$0xff]  ;;  %v1273_v62 = vld [vmem:[#allocation12 + $0x10] sm:$0xff] }
 0x278   :  { %v777_v2 = vadd.f32 %v776_v63, %v701_v58  ;;  %v1271_v58 = vld [vmem:[#allocation12] sm:$0xff]  ;;  %v1310_v54 = vld [vmem:[#allocation12 + $0x138] sm:$0xff]  ;;  %v1309_v55 = vld [vmem:[#allocation12 + $0x130] sm:$0xff] }
 0x279   :  { %v787_v9 = vadd.f32 %v785_v8, %v703_v23  ;;  %v4094_v63 = vpack.c.bf16 %v1274_v61, %v1271_v58  ;;  %v1281_v23 = vld [vmem:[#allocation12 + $0x50] sm:$0xff]  ;;  %v1312_v58 = vld [vmem:[#allocation12 + $0x148] sm:$0xff]  ;;  %v1314_v61 = vld [vmem:[#allocation12 + $0x158] sm:$0xff] }
 0x27a   :  { %v2351_v5 = vmul.f32 -1.442695, %v777_v2  ;;  %v1276_v2 = vld [vmem:[#allocation12 + $0x28] sm:$0xff] }
 0x27b   :  { %v2352_v10 = vmul.f32 -1.442695, %v787_v9  ;;  %v4097_v3 = vpack.c.bf16 %v1276_v2, %v1273_v62  ;;  %v1277_v9 = vld [vmem:[#allocation12 + $0x30] sm:$0xff] }
 0x27c   :  { %3438 = vpow2.f32 %v2351_v5  ;;  %v1278_v5 = vld [vmem:[#allocation12 + $0x38] sm:$0xff]  ;;  %v1317_v62 = vld [vmem:[#allocation12 + $0x170] sm:$0xff] }
 0x27d   :  { %3440 = vpow2.f32 %v2352_v10  ;;  %v4101_v8 = vpack.c.bf16 %v1281_v23, %v1278_v5  ;;  %v1280_v10 = vld [vmem:[#allocation12 + $0x48] sm:$0xff]  ;;  %v4156_v5 = vpack.c.bf16 %v1312_v58, %v1309_v55  ;;  %v4158_v23 = vpack.c.bf16 %v1317_v62, %v1314_v61 }
 0x286   :  { %v3439_v11 = vpop.eup %3438 }
 0x287   :  { %v781_v12 = vadd.f32 1.0, %v3439_v11  ;;  %v3441_v17 = vpop.eup %3440  ;;  %v1279_v11 = vld [vmem:[#allocation12 + $0x40] sm:$0xff] }
 0x288   :  { %v791_v27 = vadd.f32 1.0, %v3441_v17  ;;  %v4107_v17 = vpack.c.bf16 %v1282_v14, %v1279_v11  ;;  %v1315_v11 = vld [vmem:[#allocation12 + $0x160] sm:$0xff]  ;;  %v1318_v14 = vld [vmem:[#allocation12 + $0x178] sm:$0xff] }
 0x289   :  { %3442 = vrcp.f32 %v781_v12  ;;  %v4104_v12 = vpack.c.bf16 %v1280_v10, %v1277_v9  ;;  %v1313_v9 = vld [vmem:[#allocation12 + $0x150] sm:$0xff]  ;;  %v1316_v10 = vld [vmem:[#allocation12 + $0x168] sm:$0xff] }
 0x293   :  { %v3443_v19 = vpop.eup %3442 }
 0x294   :  { %v794_v20 = vmul.f32 %v3443_v19, %v772_v18  ;;  %v1284_v18 = vld [vmem:[#allocation12 + $0x68] sm:$0xff]  ;;  %v1287_v19 = vld [vmem:[#allocation12 + $0x80] sm:$0xff] }
 0x296   :  { %v797_v24 = vadd.f32 %v795_v21, %v794_v20  ;;  %v4111_v20 = vpack.c.bf16 %v1287_v19, %v1284_v18  ;;  %v1283_v21 = vld [vmem:[#allocation12 + $0x60] sm:$0xff]  ;;  %v4162_v18 = vpack.c.bf16 %v1316_v10, %v1313_v9  ;;  %v4166_v19 = vpack.c.bf16 %v1318_v14, %v1315_v11 }
 0x298   :  { %3444 = vtanh.f32 %v797_v24  ;;  %v1286_v24 = vld [vmem:[#allocation12 + $0x78] sm:$0xff] }
 0x299   :  { %3446 = vrcp.f32 %v791_v27  ;;  %v1285_v27 = vld [vmem:[#allocation12 + $0x70] sm:$0xff] }
 0x2a2   :  { %v3445_v28 = vpop.eup %3444 }
 0x2a3   :  { %v799_v29 = vsub.f32 %v3991_v53, %v3445_v28  ;;  %v3447_v36 = vpop.eup %3446 }
 0x2a5   :  { %v800_v37 = vmul.f32 %v3447_v36, %v799_v29  ;;  %v1288_v29 = vld [vmem:[#allocation12 + $0x88] sm:$0xff] }
 0x2a6   :  { %v4117_v36 = vpack.c.bf16 %v1288_v29, %v1285_v27 }
 0x2a7   :  { %v4038_v43 = vadd.f32 %v3445_v28, %v800_v37  ;;  %v4114_v28 = vpack.c.bf16 %v1286_v24, %v1283_v21  ;;  %v1290_v37 = vld [vmem:[#allocation12 + $0x98] sm:$0xff]  ;;  %v1085_v21 = vld [vmem:[%s4374_s6] sm:$0x7] }
 0x2a8   :  { %v1090_v24 = vrot.slane %v1085_v21, %v3972_v38 }
 0x2a9   :  { %802 = vst [vmem:[#allocation4 + $0x1] sm:$0x1] %v4038_v43  ;;  %933 = vmatmul.mubr.f32.vlgmr.msra.gmra.mrb[6].mxu0 %v4038_v43  ;;  %2674 = vmatmul.mubr.f32.vlgmr.msra.gmra.mrb[6].mxu1 %v4038_v43 }
 0x2aa   :  { %3113 = vmatpush1.bf16.msra.mxu0 %v3847_v30  ;;  %3144 = vmatpush3.bf16.msra.mxu1 %v3849_v32  ;;  %v851_v30 = vld [vmem:[%s4374_s6] sm:$0x7] }
 0x2ab   :  { %3115 = vmatprep.subr.bf16.mxu0 %v3852_v33  ;;  %3145 = vmatprep.subr.bf16.mxu1 %v3671_v0  ;;  %v856_v32 = vrot.slane %v851_v30, %v3972_v38 }
 0x2ac   :  { %1166 = vmatprep.mubr.f32.mxu0 %v3672_v1  ;;  %2708 = vmatprep.mubr.msk.f32.mxu1 %vm3673_vm0, %v3672_v1 }
 0x2ae   :  { %3117 = vmatpush1.bf16.msra.mxu0 %v3856_v39  ;;  %3147 = vmatpush3.bf16.msra.mxu1 %v3859_v41 }
 0x2af   :  { %3119 = vmatprep.subr.bf16.mxu0 %v3862_v42  ;;  %3148 = vmatprep.subr.bf16.mxu1 %v3671_v0 }
 0x2b2   :  { %3121 = vmatpush1.bf16.msra.mxu0 %v3869_v48  ;;  %3150 = vmatpush3.bf16.msra.mxu1 %v3872_v50  ;;  %v1010_v50 = vld [vmem:[#allocation3 + $0x2] ss:$8 sm:$0x7] }
 0x2b3   :  { %3123 = vmatprep.subr.bf16.mxu0 %v3875_v51  ;;  %3151 = vmatprep.subr.bf16.mxu1 %v3671_v0 }
 0x2b6   :  { %3125 = vmatpush1.bf16.msra.mxu0 %v3879_v57  ;;  %3153 = vmatpush3.bf16.msra.mxu1 %v3882_v59  ;;  %v860_v57 = vrot.slane %v851_v30, %v3979_v44 }
 0x2b7   :  { %3127 = vmatprep.subr.bf16.mxu0 %v3885_v60  ;;  %3154 = vmatprep.subr.bf16.mxu1 %v3671_v0 }
 0x2ba   :  { %3129 = vmatpush1.bf16.msra.mxu0 %v3889_v4  ;;  %3156 = vmatpush3.bf16.msra.mxu1 %v3892_v6  ;;  %v1019_v4 = vrot.slane %v1010_v50, 1 }
 0x2bb   :  { %3131 = vmatprep.subr.bf16.mxu0 %v3895_v7  ;;  %3157 = vmatprep.subr.bf16.mxu1 %v3671_v0 }
 0x2be   :  { %3133 = vmatpush1.bf16.msra.mxu0 %v3899_v13  ;;  %3159 = vmatpush3.bf16.msra.mxu1 %v3902_v15 }
 0x2bf   :  { %3135 = vmatprep.subr.bf16.mxu0 %v3905_v16  ;;  %3160 = vmatprep.subr.bf16.mxu1 %v3671_v0  ;;  %v864_v16 = vrot.slane %v851_v30, %v3974_v40 }
 0x2c2   :  { %3137 = vmatpush1.bf16.msra.mxu0 %v3909_v22  ;;  %3162 = vmatpush3.bf16.msra.mxu1 %v3912_v25 }
 0x2c3   :  { %3139 = vmatprep.subr.bf16.mxu0 %v3915_v26  ;;  %3163 = vmatprep.subr.bf16.mxu1 %v3671_v0 }
 0x2c6   :  { %3141 = vmatpush1.bf16.msra.mxu0 %v3919_v31  ;;  %3165 = vmatpush3.bf16.msra.mxu1 %v3922_v34  ;;  %v1029_v34 = vrot.slane %v1010_v50, 2 }
 0x2c7   :  { %3198 = vmatprep.subr.bf16.mxu1 %v3671_v0  ;;  %3167 = vmatprep.subr.bf16.mxu0 %v4092_v56 }
 0x37c   :  { %v934_v33 = vpop.f32.mrb[6].mxu0  ;;  %v1005_v39 = vpop.f32.mrb[6].mxu1 }
 0x37d   :  { %v935_v41 = vadd.f32 %v934_v33, %v856_v32  ;;  %v936_v42 = vpop.f32.mrb[7].mxu0  ;;  %v2675_v48 = vpop.f32.mrb[7].mxu1  ;;  %v1006_v25 = vadd.f32 %v1005_v39, %v864_v16  ;;  %v1289_v32 = vld [vmem:[#allocation12 + $0x90] sm:$0xff]  ;;  %v1292_v33 = vld [vmem:[#allocation12 + $0xa8] sm:$0xff]  ;;  %v1291_v39 = vld [vmem:[#allocation12 + $0xa0] sm:$0xff] }
 0x37e   :  { %v937_v60 = vadd.f32 %v936_v42, %v860_v57  ;;  %v1294_v42 = vld [vmem:[#allocation12 + $0xb8] sm:$0xff]  ;;  %v1295_v57 = vld [vmem:[#allocation12 + $0xc0] sm:$0xff]  ;;  %v1305_v16 = vld [vmem:[#allocation12 + $0x110] sm:$0xff] }
 0x37f   :  { %v1011_v51 = vadd.f32 %v1010_v50, %v935_v41  ;;  %v4124_v41 = vpack.c.bf16 %v1292_v33, %v1289_v32  ;;  %v4127_v48 = vpack.c.bf16 %v1294_v42, %v1291_v39  ;;  %v1296_v50 = vld [vmem:[#allocation12 + $0xc8] sm:$0xff]  ;;  %v1094_v42 = vrot.slane %v1085_v21, %v3979_v44 }
 0x380   :  { %v1021_v6 = vadd.f32 %v1019_v4, %v937_v60  ;;  %v1298_v60 = vld [vmem:[#allocation12 + $0xd8] sm:$0xff]  ;;  %v1297_v4 = vld [vmem:[#allocation12 + $0xd0] sm:$0xff] }
 0x381   :  { %v2353_v59 = vmul.f32 -1.442695, %v1011_v51  ;;  %v1299_v51 = vld [vmem:[#allocation12 + $0xe0] sm:$0xff] }
 0x382   :  { %v2354_v7 = vmul.f32 -1.442695, %v1021_v6  ;;  %v1300_v6 = vld [vmem:[#allocation12 + $0xe8] sm:$0xff] }
 0x383   :  { %3448 = vpow2.f32 %v2353_v59  ;;  %v4131_v59 = vpack.c.bf16 %v1299_v51, %v1296_v50  ;;  %v1244_v33 = vld [vmem:[#allocation3 + $0x3] ss:$8 sm:$0x7] }
 0x384   :  { %3450 = vpow2.f32 %v2354_v7  ;;  %v4134_v7 = vpack.c.bf16 %v1298_v60, %v1295_v57  ;;  %v1253_v57 = vrot.slane %v1244_v33, 1 }
 0x38d   :  { %v3449_v13 = vpop.eup %3448 }
 0x38e   :  { %v1015_v15 = vadd.f32 1.0, %v3449_v13  ;;  %v3451_v22 = vpop.eup %3450  ;;  %v4136_v13 = vpack.c.bf16 %v1300_v6, %v1297_v4 }
 0x38f   :  { %v1025_v46 = vadd.f32 1.0, %v3451_v22  ;;  %v1301_v22 = vld [vmem:[#allocation12 + $0xf0] sm:$0xff] }
 0x390   :  { %3452 = vrcp.f32 %v1015_v15  ;;  %v1302_v15 = vld [vmem:[#allocation12 + $0xf8] sm:$0xff] }
 0x39a   :  { %v3453_v26 = vpop.eup %3452 }
 0x39b   :  { %v1028_v31 = vmul.f32 %v3453_v26, %v1006_v25  ;;  %v4139_v25 = vpack.c.bf16 %v1305_v16, %v1302_v15  ;;  %v1304_v26 = vld [vmem:[#allocation12 + $0x108] sm:$0xff]  ;;  %v1098_v16 = vrot.slane %v1085_v21, %v3974_v40 }
 0x39d   :  { %v1031_v45 = vadd.f32 %v1029_v34, %v1028_v31  ;;  %v1303_v31 = vld [vmem:[#allocation12 + $0x100] sm:$0xff]  ;;  %v1306_v34 = vld [vmem:[#allocation12 + $0x118] sm:$0xff] }
 0x39f   :  { %3454 = vtanh.f32 %v1031_v45  ;;  %v4142_v45 = vpack.c.bf16 %v1304_v26, %v1301_v22 }
 0x3a0   :  { %3456 = vrcp.f32 %v1025_v46  ;;  %v1308_v46 = vld [vmem:[#allocation12 + $0x128] sm:$0xff] }
 0x3a9   :  { %v3455_v47 = vpop.eup %3454 }
 0x3aa   :  { %v1033_v49 = vsub.f32 %v4038_v43, %v3455_v47  ;;  %v3457_v52 = vpop.eup %3456  ;;  %v1293_v43 = vld [vmem:[#allocation12 + $0xb0] sm:$0xff] }
 0x3ab   :  { %v4121_v30 = vpack.c.bf16 %v1293_v43, %v1290_v37 }
 0x3ac   :  { %v1034_v53 = vmul.f32 %v3457_v52, %v1033_v49  ;;  %v4146_v49 = vpack.c.bf16 %v1306_v34, %v1303_v31 }
 0x3ae   :  { %v4084_v35 = vadd.f32 %v3455_v47, %v1034_v53  ;;  %v1311_v47 = vld [vmem:[#allocation12 + $0x140] sm:$0xff] }
 0x3af   :  { %v4148_v52 = vpack.c.bf16 %v1311_v47, %v1308_v46  ;;  %v1307_v53 = vld [vmem:[#allocation12 + $0x120] sm:$0xff]  ;;  %v1263_v46 = vrot.slane %v1244_v33, 2 }
 0x3b0   :  { %1036 = vst [vmem:[#allocation4 + $0x2] sm:$0x1] %v4084_v35  ;;  %1167 = vmatmul.mubr.f32.vlgmr.msra.gmra.mrb[8].mxu0 %v4084_v35  ;;  %2709 = vmatmul.mubr.f32.vlgmr.msra.gmra.mrb[8].mxu1 %v4084_v35  ;;  %v4152_v2 = vpack.c.bf16 %v1310_v54, %v1307_v53 }
 0x3b1   :  { %1400 = vmatprep.mubr.f32.mxu0 %v3672_v1  ;;  %2743 = vmatprep.mubr.msk.f32.mxu1 %vm3673_vm0, %v3672_v1 }
 0x3b2   :  { %3169 = vmatpush1.bf16.msra.mxu0 %v4094_v63  ;;  %3200 = vmatpush3.bf16.msra.mxu1 %v4097_v3 }
 0x3b3   :  { %3201 = vmatprep.subr.bf16.mxu1 %v3671_v0  ;;  %3171 = vmatprep.subr.bf16.mxu0 %v4101_v8 }
 0x3b6   :  { %3173 = vmatpush1.bf16.msra.mxu0 %v4104_v12  ;;  %3203 = vmatpush3.bf16.msra.mxu1 %v4107_v17 }
 0x3b7   :  { %3204 = vmatprep.subr.bf16.mxu1 %v3671_v0  ;;  %3175 = vmatprep.subr.bf16.mxu0 %v4111_v20 }
 0x3ba   :  { %3177 = vmatpush1.bf16.msra.mxu0 %v4114_v28  ;;  %3206 = vmatpush3.bf16.msra.mxu1 %v4117_v36 }
 0x3bb   :  { %3207 = vmatprep.subr.bf16.mxu1 %v3671_v0  ;;  %3179 = vmatprep.subr.bf16.mxu0 %v4121_v30 }
 0x3be   :  { %3181 = vmatpush1.bf16.msra.mxu0 %v4124_v41  ;;  %3209 = vmatpush3.bf16.msra.mxu1 %v4127_v48 }
 0x3bf   :  { %3210 = vmatprep.subr.bf16.mxu1 %v3671_v0  ;;  %3183 = vmatprep.subr.bf16.mxu0 %v4131_v59 }
 0x3c2   :  { %3185 = vmatpush1.bf16.msra.mxu0 %v4134_v7  ;;  %3212 = vmatpush3.bf16.msra.mxu1 %v4136_v13 }
 0x3c3   :  { %3187 = vmatprep.subr.bf16.mxu0 %v4139_v25  ;;  %3213 = vmatprep.subr.bf16.mxu1 %v3671_v0 }
 0x3c6   :  { %3189 = vmatpush1.bf16.msra.mxu0 %v4142_v45  ;;  %3215 = vmatpush3.bf16.msra.mxu1 %v4146_v49 }
 0x3c7   :  { %3191 = vmatprep.subr.bf16.mxu0 %v4148_v52  ;;  %3216 = vmatprep.subr.bf16.mxu1 %v3671_v0 }
 0x3ca   :  { %3193 = vmatpush1.bf16.msra.mxu0 %v4152_v2  ;;  %3218 = vmatpush3.bf16.msra.mxu1 %v4156_v5 }
 0x3cb   :  { %3195 = vmatprep.subr.bf16.mxu0 %v4158_v23  ;;  %3219 = vmatprep.subr.bf16.mxu1 %v3671_v0 }
 0x3ce   :  { %3197 = vmatpush1.bf16.msra.mxu0 %v4162_v18  ;;  %3221 = vmatpush3.bf16.msra.mxu1 %v4166_v19 }
 0x3cf   :  { %3223 = vmatprep.subr.bf16.mxu0 %v4092_v56  ;;  %3254 = vmatprep.subr.bf16.mxu1 %v3671_v0 }
 0x483   :  { %v1168_v27 = vpop.f32.mrb[8].mxu0  ;;  %v1239_v29 = vpop.f32.mrb[8].mxu1 }
 0x484   :  { %v1169_v37 = vadd.f32 %v1168_v27, %v1090_v24  ;;  %v1170_v43 = vpop.f32.mrb[9].mxu0  ;;  %v2710_v32 = vpop.f32.mrb[9].mxu1  ;;  %v1240_v26 = vadd.f32 %v1239_v29, %v1098_v16  ;;  %v1478_v27 = vld [vmem:[#allocation3 + $0x4] ss:$8 sm:$0x7] }
 0x485   :  { %v1171_v51 = vadd.f32 %v1170_v43, %v1094_v42  ;;  %v1497_v16 = vrot.slane %v1478_v27, 2 }
 0x486   :  { %v1245_v39 = vadd.f32 %v1244_v33, %v1169_v37  ;;  %v1487_v33 = vrot.slane %v1478_v27, 1 }
 0x487   :  { %v1255_v60 = vadd.f32 %v1253_v57, %v1171_v51 }
 0x488   :  { %v2355_v50 = vmul.f32 -1.442695, %v1245_v39 }
 0x489   :  { %v2356_v4 = vmul.f32 -1.442695, %v1255_v60 }
 0x48a   :  { %3458 = vpow2.f32 %v2355_v50 }
 0x48b   :  { %3460 = vpow2.f32 %v2356_v4 }
 0x494   :  { %v3459_v6 = vpop.eup %3458 }
 0x495   :  { %v1249_v15 = vadd.f32 1.0, %v3459_v6  ;;  %v3461_v22 = vpop.eup %3460 }
 0x496   :  { %v1259_v53 = vadd.f32 1.0, %v3461_v22 }
 0x497   :  { %3462 = vrcp.f32 %v1249_v15 }
 0x4a1   :  { %v3463_v31 = vpop.eup %3462 }
 0x4a2   :  { %v1262_v34 = vmul.f32 %v3463_v31, %v1240_v26 }
 0x4a4   :  { %v1265_v47 = vadd.f32 %v1263_v46, %v1262_v34 }
 0x4a6   :  { %3464 = vtanh.f32 %v1265_v47 }
 0x4a7   :  { %3466 = vrcp.f32 %v1259_v53 }
 0x4b0   :  { %v3465_v54 = vpop.eup %3464 }
 0x4b1   :  { %v1267_v55 = vsub.f32 %v4084_v35, %v3465_v54  ;;  %v3467_v58 = vpop.eup %3466  ;;  %v1319_v35 = vld [vmem:[%s4374_s6] sm:$0x7] }
 0x4b2   :  { %v1324_v9 = vrot.slane %v1319_v35, %v3972_v38  ;;  %v1328_v37 = vrot.slane %v1319_v35, %v3979_v44  ;;  %v1332_v57 = vrot.slane %v1319_v35, %v3974_v40 }
 0x4b3   :  { %v1268_v61 = vmul.f32 %v3467_v58, %v1267_v55 }
 0x4b5   :  { %v4180_v62 = vadd.f32 %v3465_v54, %v1268_v61  ;;  %v1553_v54 = vld [vmem:[%s4374_s6] sm:$0x7] }
 0x4b6   :  { %v1558_v55 = vrot.slane %v1553_v54, %v3972_v38 }
 0x4b7   :  { %1270 = vst [vmem:[#allocation4 + $0x3] sm:$0x1] %v4180_v62  ;;  %1401 = vmatmul.mubr.f32.vlgmr.msra.gmra.mrb[10].mxu0 %v4180_v62  ;;  %2744 = vmatmul.mubr.f32.vlgmr.msra.gmra.mrb[10].mxu1 %v4180_v62 }
 0x4b8   :  { %3225 = vmatpush1.bf16.msra.mxu0 %v4094_v63  ;;  %3256 = vmatpush3.bf16.msra.mxu1 %v4097_v3 }
 0x4b9   :  { %3227 = vmatprep.subr.bf16.mxu0 %v4101_v8  ;;  %3257 = vmatprep.subr.bf16.mxu1 %v3671_v0 }
 0x4ba   :  { %1634 = vmatprep.mubr.f32.mxu0 %v3672_v1  ;;  %2778 = vmatprep.mubr.msk.f32.mxu1 %vm3673_vm0, %v3672_v1 }
 0x4bc   :  { %3229 = vmatpush1.bf16.msra.mxu0 %v4104_v12  ;;  %3259 = vmatpush3.bf16.msra.mxu1 %v4107_v17 }
 0x4bd   :  { %3231 = vmatprep.subr.bf16.mxu0 %v4111_v20  ;;  %3260 = vmatprep.subr.bf16.mxu1 %v3671_v0 }
 0x4c0   :  { %3233 = vmatpush1.bf16.msra.mxu0 %v4114_v28  ;;  %3262 = vmatpush3.bf16.msra.mxu1 %v4117_v36 }
 0x4c1   :  { %3235 = vmatprep.subr.bf16.mxu0 %v4121_v30  ;;  %3263 = vmatprep.subr.bf16.mxu1 %v3671_v0 }
 0x4c4   :  { %3237 = vmatpush1.bf16.msra.mxu0 %v4124_v41  ;;  %3265 = vmatpush3.bf16.msra.mxu1 %v4127_v48 }
 0x4c5   :  { %3239 = vmatprep.subr.bf16.mxu0 %v4131_v59  ;;  %3266 = vmatprep.subr.bf16.mxu1 %v3671_v0 }
 0x4c8   :  { %3241 = vmatpush1.bf16.msra.mxu0 %v4134_v7  ;;  %3268 = vmatpush3.bf16.msra.mxu1 %v4136_v13 }
 0x4c9   :  { %3243 = vmatprep.subr.bf16.mxu0 %v4139_v25  ;;  %3269 = vmatprep.subr.bf16.mxu1 %v3671_v0 }
 0x4cc   :  { %3245 = vmatpush1.bf16.msra.mxu0 %v4142_v45  ;;  %3271 = vmatpush3.bf16.msra.mxu1 %v4146_v49 }
 0x4cd   :  { %3247 = vmatprep.subr.bf16.mxu0 %v4148_v52  ;;  %3272 = vmatprep.subr.bf16.mxu1 %v3671_v0 }
 0x4d0   :  { %3249 = vmatpush1.bf16.msra.mxu0 %v4152_v2  ;;  %3274 = vmatpush3.bf16.msra.mxu1 %v4156_v5 }
 0x4d1   :  { %3251 = vmatprep.subr.bf16.mxu0 %v4158_v23  ;;  %3275 = vmatprep.subr.bf16.mxu1 %v3671_v0 }
 0x4d4   :  { %3253 = vmatpush1.bf16.msra.mxu0 %v4162_v18  ;;  %3277 = vmatpush3.bf16.msra.mxu1 %v4166_v19 }
 0x4d5   :  { %3279 = vmatprep.subr.bf16.mxu0 %v4092_v56  ;;  %3310 = vmatprep.subr.bf16.mxu1 %v3671_v0 }
 0x58a   :  { %v1402_v10 = vpop.f32.mrb[10].mxu0  ;;  %v1473_v11 = vpop.f32.mrb[10].mxu1 }
 0x58b   :  { %v1403_v14 = vadd.f32 %v1402_v10, %v1324_v9  ;;  %v1404_v21 = vpop.f32.mrb[11].mxu0  ;;  %v2745_v24 = vpop.f32.mrb[11].mxu1  ;;  %v1474_v4 = vadd.f32 %v1473_v11, %v1332_v57  ;;  %v1712_v10 = vld [vmem:[#allocation3 + $0x5] ss:$8 sm:$0x7] }
 0x58c   :  { %v1405_v32 = vadd.f32 %v1404_v21, %v1328_v37  ;;  %v1721_v24 = vrot.slane %v1712_v10, 1 }
 0x58d   :  { %v1479_v29 = vadd.f32 %v1478_v27, %v1403_v14  ;;  %v1562_v14 = vrot.slane %v1553_v54, %v3979_v44 }
 0x58e   :  { %v1489_v39 = vadd.f32 %v1487_v33, %v1405_v32  ;;  %v1566_v32 = vrot.slane %v1553_v54, %v3974_v40 }
 0x58f   :  { %v2357_v43 = vmul.f32 -1.442695, %v1479_v29 }
 0x590   :  { %v2358_v42 = vmul.f32 -1.442695, %v1489_v39 }
 0x591   :  { %3468 = vpow2.f32 %v2357_v43 }
 0x592   :  { %3470 = vpow2.f32 %v2358_v42 }
 0x59b   :  { %v3469_v50 = vpop.eup %3468 }
 0x59c   :  { %v1483_v51 = vadd.f32 1.0, %v3469_v50  ;;  %v3471_v60 = vpop.eup %3470 }
 0x59d   :  { %v1493_v26 = vadd.f32 1.0, %v3471_v60 }
 0x59e   :  { %3472 = vrcp.f32 %v1483_v51  ;;  %v1731_v51 = vrot.slane %v1712_v10, 2 }
 0x5a8   :  { %v3473_v6 = vpop.eup %3472 }
 0x5a9   :  { %v1496_v15 = vmul.f32 %v3473_v6, %v1474_v4 }
 0x5ab   :  { %v1499_v22 = vadd.f32 %v1497_v16, %v1496_v15 }
 0x5ad   :  { %3474 = vtanh.f32 %v1499_v22 }
 0x5ae   :  { %3476 = vrcp.f32 %v1493_v26 }
 0x5b7   :  { %v3475_v31 = vpop.eup %3474 }
 0x5b8   :  { %v1501_v34 = vsub.f32 %v4180_v62, %v3475_v31  ;;  %v3477_v46 = vpop.eup %3476 }
 0x5ba   :  { %v1502_v47 = vmul.f32 %v3477_v46, %v1501_v34 }
 0x5bc   :  { %v4227_v53 = vadd.f32 %v3475_v31, %v1502_v47 }
 0x5be   :  { %1504 = vst [vmem:[#allocation4 + $0x4] sm:$0x1] %v4227_v53  ;;  %1635 = vmatmul.mubr.f32.vlgmr.msra.gmra.mrb[12].mxu0 %v4227_v53  ;;  %2779 = vmatmul.mubr.f32.vlgmr.msra.gmra.mrb[12].mxu1 %v4227_v53 }
 0x5bf   :  { %3281 = vmatpush1.bf16.msra.mxu0 %v4094_v63  ;;  %3312 = vmatpush3.bf16.msra.mxu1 %v4097_v3 }
 0x5c0   :  { %3283 = vmatprep.subr.bf16.mxu0 %v4101_v8  ;;  %3313 = vmatprep.subr.bf16.mxu1 %v3671_v0 }
 0x5c1   :  { %1868 = vmatprep.mubr.f32.mxu0 %v3672_v1  ;;  %2813 = vmatprep.mubr.msk.f32.mxu1 %vm3673_vm0, %v3672_v1 }
 0x5c3   :  { %3285 = vmatpush1.bf16.msra.mxu0 %v4104_v12  ;;  %3315 = vmatpush3.bf16.msra.mxu1 %v4107_v17 }
 0x5c4   :  { %3287 = vmatprep.subr.bf16.mxu0 %v4111_v20  ;;  %3316 = vmatprep.subr.bf16.mxu1 %v3671_v0 }
 0x5c7   :  { %3289 = vmatpush1.bf16.msra.mxu0 %v4114_v28  ;;  %3318 = vmatpush3.bf16.msra.mxu1 %v4117_v36 }
 0x5c8   :  { %3291 = vmatprep.subr.bf16.mxu0 %v4121_v30  ;;  %3319 = vmatprep.subr.bf16.mxu1 %v3671_v0 }
 0x5cb   :  { %3293 = vmatpush1.bf16.msra.mxu0 %v4124_v41  ;;  %3321 = vmatpush3.bf16.msra.mxu1 %v4127_v48 }
 0x5cc   :  { %3295 = vmatprep.subr.bf16.mxu0 %v4131_v59  ;;  %3322 = vmatprep.subr.bf16.mxu1 %v3671_v0 }
 0x5cf   :  { %3297 = vmatpush1.bf16.msra.mxu0 %v4134_v7  ;;  %3324 = vmatpush3.bf16.msra.mxu1 %v4136_v13 }
 0x5d0   :  { %3299 = vmatprep.subr.bf16.mxu0 %v4139_v25  ;;  %3325 = vmatprep.subr.bf16.mxu1 %v3671_v0 }
 0x5d3   :  { %3301 = vmatpush1.bf16.msra.mxu0 %v4142_v45  ;;  %3327 = vmatpush3.bf16.msra.mxu1 %v4146_v49 }
 0x5d4   :  { %3303 = vmatprep.subr.bf16.mxu0 %v4148_v52  ;;  %3328 = vmatprep.subr.bf16.mxu1 %v3671_v0 }
 0x5d7   :  { %3305 = vmatpush1.bf16.msra.mxu0 %v4152_v2  ;;  %3330 = vmatpush3.bf16.msra.mxu1 %v4156_v5 }
 0x5d8   :  { %3307 = vmatprep.subr.bf16.mxu0 %v4158_v23  ;;  %3331 = vmatprep.subr.bf16.mxu1 %v3671_v0 }
 0x5db   :  { %3309 = vmatpush1.bf16.msra.mxu0 %v4162_v18  ;;  %3333 = vmatpush3.bf16.msra.mxu1 %v4166_v19 }
 0x5dc   :  { %3335 = vmatprep.subr.bf16.mxu0 %v4092_v56  ;;  %3366 = vmatprep.subr.bf16.mxu1 %v3671_v0 }
 0x691   :  { %v1636_v58 = vpop.f32.mrb[12].mxu0  ;;  %v1707_v61 = vpop.f32.mrb[12].mxu1 }
 0x692   :  { %v1637_v62 = vadd.f32 %v1636_v58, %v1558_v55  ;;  %v1638_v35 = vpop.f32.mrb[13].mxu0  ;;  %v2780_v9 = vpop.f32.mrb[13].mxu1  ;;  %v1708_v39 = vadd.f32 %v1707_v61, %v1566_v32  ;;  %v2208_v55 = vld [vmem:[#allocation13] sm:$0xff]  ;;  %v2209_v58 = vld [vmem:[#allocation13 + $0x8] sm:$0xff] }
 0x693   :  { %v1639_v56 = vadd.f32 %v1638_v35, %v1562_v14  ;;  %v3391_v61 = vpack.c.bf16 %v2209_v58, %v2208_v55  ;;  %v2211_v35 = vld [vmem:[#allocation13 + $0x18] sm:$0xff]  ;;  %v2220_v32 = vld [vmem:[#allocation13 + $0x60] sm:$0xff] }
 0x694   :  { %v1713_v11 = vadd.f32 %v1712_v10, %v1637_v62  ;;  %v2210_v62 = vld [vmem:[#allocation13 + $0x10] sm:$0xff]  ;;  %v2212_v10 = vld [vmem:[#allocation13 + $0x20] sm:$0xff] }
 0x695   :  { %v1723_v27 = vadd.f32 %v1721_v24, %v1639_v56  ;;  %v3394_v9 = vpack.c.bf16 %v2211_v35, %v2210_v62  ;;  %v2216_v24 = vld [vmem:[#allocation13 + $0x40] sm:$0xff] }
 0x696   :  { %v2359_v21 = vmul.f32 -1.442695, %v1713_v11  ;;  %v2213_v11 = vld [vmem:[#allocation13 + $0x28] sm:$0xff] }
 0x697   :  { %v2360_v29 = vmul.f32 -1.442695, %v1723_v27  ;;  %v3397_v14 = vpack.c.bf16 %v2213_v11, %v2212_v10  ;;  %v2217_v27 = vld [vmem:[#allocation13 + $0x48] sm:$0xff] }
 0x698   :  { %3478 = vpow2.f32 %v2359_v21  ;;  %v2214_v21 = vld [vmem:[#allocation13 + $0x30] sm:$0xff] }
 0x699   :  { %3480 = vpow2.f32 %v2360_v29  ;;  %v3403_v29 = vpack.c.bf16 %v2217_v27, %v2216_v24 }
 0x6a2   :  { %v3479_v37 = vpop.eup %3478 }
 0x6a3   :  { %v1717_v43 = vadd.f32 1.0, %v3479_v37  ;;  %v3481_v33 = vpop.eup %3480  ;;  %v2218_v37 = vld [vmem:[#allocation13 + $0x50] sm:$0xff] }
 0x6a4   :  { %v1727_v60 = vadd.f32 1.0, %v3481_v33 }
 0x6a5   :  { %3482 = vrcp.f32 %v1717_v43  ;;  %v2219_v43 = vld [vmem:[#allocation13 + $0x58] sm:$0xff] }
 0x6a6   :  { %v3406_v33 = vpack.c.bf16 %v2219_v43, %v2218_v37 }
 0x6af   :  { %v3483_v42 = vpop.eup %3482 }
 0x6b0   :  { %v1730_v50 = vmul.f32 %v3483_v42, %v1708_v39  ;;  %v2221_v39 = vld [vmem:[#allocation13 + $0x68] sm:$0xff] }
 0x6b1   :  { %v3409_v42 = vpack.c.bf16 %v2221_v39, %v2220_v32 }
 0x6b2   :  { %v1733_v57 = vadd.f32 %v1731_v51, %v1730_v50  ;;  %v2222_v50 = vld [vmem:[#allocation13 + $0x70] sm:$0xff]  ;;  %v2223_v51 = vld [vmem:[#allocation13 + $0x78] sm:$0xff] }
 0x6b4   :  { %3484 = vtanh.f32 %v1733_v57  ;;  %v3412_v57 = vpack.c.bf16 %v2223_v51, %v2222_v50 }
 0x6b5   :  { %3486 = vrcp.f32 %v1727_v60  ;;  %v2021_v60 = vld [vmem:[%s4374_s6] sm:$0x7] }
 0x6be   :  { %v3485_v4 = vpop.eup %3484 }
 0x6bf   :  { %v1735_v6 = vsub.f32 %v4227_v53, %v3485_v4  ;;  %v3487_v15 = vpop.eup %3486 }
 0x6c1   :  { %v1736_v16 = vmul.f32 %v3487_v15, %v1735_v6 }
 0x6c3   :  { %v4274_v22 = vadd.f32 %v3485_v4, %v1736_v16  ;;  %v2026_v4 = vrot.slane %v2021_v60, %v3972_v38 }
 0x6c5   :  { %1738 = vst [vmem:[#allocation4 + $0x5] sm:$0x1] %v4274_v22  ;;  %1869 = vmatmul.mubr.f32.vlgmr.msra.gmra.mrb[14].mxu0 %v4274_v22  ;;  %2814 = vmatmul.mubr.f32.vlgmr.msra.gmra.mrb[14].mxu1 %v4274_v22 }
 0x6c6   :  { %3337 = vmatpush1.bf16.msra.mxu0 %v4094_v63  ;;  %3368 = vmatpush3.bf16.msra.mxu1 %v4097_v3  ;;  %v1787_v63 = vld [vmem:[%s4374_s6] sm:$0x7]  ;;  %s3674_s6 = smov [#allocation16]  }
 0x6c7   :  { %3339 = vmatprep.subr.bf16.mxu0 %v4101_v8  ;;  %3369 = vmatprep.subr.bf16.mxu1 %v3671_v0  ;;  %v1792_v3 = vrot.slane %v1787_v63, %v3972_v38  ;;  %v2034_v38 = vrot.slane %v2021_v60, %v3974_v40  ;;  %s2319_s19 = sshll.u32 %s3674_s6, 4  ;;  %s2320_s19 = int_to_ptr.vmem [resolvable:$true] %s2319_s19 }
 0x6c8   :  { %2102 = vmatprep.mubr.f32.mxu0 %v3672_v1  ;;  %2848 = vmatprep.mubr.msk.f32.mxu1 %vm3673_vm0, %v3672_v1  ;;  %s3606_s20 = scalar_lea.vmem %s2320_s19, 16  ;;  %s3610_s21 = scalar_lea.vmem %s2320_s19, 32 }
 0x6c9   :  { %p3607_p7 = scmp.ne.s32.totalorder %s2320_s19, %s3606_s20  ;;  %p3611_p8 = scmp.lt.s32.totalorder %s2320_s19, %s2320_s19 }
 0x6ca   :  { %3341 = vmatpush1.bf16.msra.mxu0 %v4104_v12  ;;  %3371 = vmatpush3.bf16.msra.mxu1 %v4107_v17  ;;  %p3612_p9 = scmp.lt.s32.totalorder %s3610_s21, %s3606_s20 }
 0x6cb   :  { %3343 = vmatprep.subr.bf16.mxu0 %v4111_v20  ;;  %3372 = vmatprep.subr.bf16.mxu1 %v3671_v0 }
 0x6cc   :  { %p3613_p10 = por %p3612_p9, %p3611_p8 }
 0x6ce   :  { %3345 = vmatpush1.bf16.msra.mxu0 %v4114_v28  ;;  %3374 = vmatpush3.bf16.msra.mxu1 %v4117_v36  ;;  %v1946_v36 = vld [vmem:[#allocation3 + $0x6] ss:$8 sm:$0x7]  ;;  %p3614_p11 = pnand %p3613_p10, %p3607_p7 }
 0x6cf   :  { %3347 = vmatprep.subr.bf16.mxu0 %v4121_v30  ;;  %3375 = vmatprep.subr.bf16.mxu1 %v3671_v0 }
 0x6d2   :  { %3349 = vmatpush1.bf16.msra.mxu0 %v4124_v41  ;;  %3377 = vmatpush3.bf16.msra.mxu1 %v4127_v48  ;;  %v1796_v41 = vrot.slane %v1787_v63, %v3979_v44 }
 0x6d3   :  { %3351 = vmatprep.subr.bf16.mxu0 %v4131_v59  ;;  %3378 = vmatprep.subr.bf16.mxu1 %v3671_v0 }
 0x6d6   :  { %3353 = vmatpush1.bf16.msra.mxu0 %v4134_v7  ;;  %3380 = vmatpush3.bf16.msra.mxu1 %v4136_v13  ;;  %v1955_v7 = vrot.slane %v1946_v36, 1 }
 0x6d7   :  { %3355 = vmatprep.subr.bf16.mxu0 %v4139_v25  ;;  %3381 = vmatprep.subr.bf16.mxu1 %v3671_v0 }
 0x6da   :  { %3357 = vmatpush1.bf16.msra.mxu0 %v4142_v45  ;;  %3383 = vmatpush3.bf16.msra.mxu1 %v4146_v49 }
 0x6db   :  { %3359 = vmatprep.subr.bf16.mxu0 %v4148_v52  ;;  %3384 = vmatprep.subr.bf16.mxu1 %v3671_v0  ;;  %v1800_v52 = vrot.slane %v1787_v63, %v3974_v40 }
 0x6de   :  { %3361 = vmatpush1.bf16.msra.mxu0 %v4152_v2  ;;  %3386 = vmatpush3.bf16.msra.mxu1 %v4156_v5 }
 0x6df   :  { %3363 = vmatprep.subr.bf16.mxu0 %v4158_v23  ;;  %3387 = vmatprep.subr.bf16.mxu1 %v3671_v0 }
 0x6e2   :  { %3365 = vmatpush1.bf16.msra.mxu0 %v4162_v18  ;;  %3389 = vmatpush3.bf16.msra.mxu1 %v4166_v19  ;;  %v1965_v19 = vrot.slane %v1946_v36, 2 }
 0x6e3   :  { %3390 = vmatprep.subr.bf16.mxu0 %v3671_v0 }
 0x798   :  { %v1870_v8 = vpop.f32.mrb[14].mxu0  ;;  %v1941_v12 = vpop.f32.mrb[14].mxu1 }
 0x799   :  { %v1871_v17 = vadd.f32 %v1870_v8, %v1792_v3  ;;  %v1872_v20 = vpop.f32.mrb[15].mxu0  ;;  %v2815_v28 = vpop.f32.mrb[15].mxu1  ;;  %v1942_v5 = vadd.f32 %v1941_v12, %v1800_v52  ;;  %v2180_v3 = vld [vmem:[#allocation3 + $0x7] ss:$8 sm:$0x7]  ;;  %v2030_v12 = vrot.slane %v2021_v60, %v3979_v44 }
 0x79a   :  { %v1873_v59 = vadd.f32 %v1872_v20, %v1796_v41 }
 0x79b   :  { %v1947_v30 = vadd.f32 %v1946_v36, %v1871_v17 }
 0x79c   :  { %v1957_v13 = vadd.f32 %v1955_v7, %v1873_v59 }
 0x79d   :  { %v2361_v48 = vmul.f32 -1.442695, %v1947_v30 }
 0x79e   :  { %v2362_v25 = vmul.f32 -1.442695, %v1957_v13 }
 0x79f   :  { %3488 = vpow2.f32 %v2361_v48 }
 0x7a0   :  { %3490 = vpow2.f32 %v2362_v25  ;;  %v2199_v25 = vrot.slane %v2180_v3, 2 }
 0x7a9   :  { %v3489_v45 = vpop.eup %3488 }
 0x7aa   :  { %v1951_v49 = vadd.f32 1.0, %v3489_v45  ;;  %v3491_v2 = vpop.eup %3490 }
 0x7ab   :  { %v1961_v31 = vadd.f32 1.0, %v3491_v2 }
 0x7ac   :  { %3492 = vrcp.f32 %v1951_v49 }
 0x7b6   :  { %v3493_v23 = vpop.eup %3492 }
 0x7b7   :  { %v1964_v18 = vmul.f32 %v3493_v23, %v1942_v5 }
 0x7b9   :  { %v1967_v26 = vadd.f32 %v1965_v19, %v1964_v18 }
 0x7bb   :  { %3494 = vtanh.f32 %v1967_v26 }
 0x7bc   :  { %3496 = vrcp.f32 %v1961_v31 }
 0x7c5   :  { %v3495_v34 = vpop.eup %3494 }
 0x7c6   :  { %v1969_v46 = vsub.f32 %v4274_v22, %v3495_v34  ;;  %v3497_v47 = vpop.eup %3496 }
 0x7c8   :  { %v1970_v53 = vmul.f32 %v3497_v47, %v1969_v46 }
 0x7ca   :  { %v4320_v54 = vadd.f32 %v3495_v34, %v1970_v53 }
 0x7cc   :  { %1972 = vst [vmem:[#allocation4 + $0x6] sm:$0x1] %v4320_v54  ;;  %2103 = vmatmul.mubr.f32.vlgmr.msra.gmra.mrb[16].mxu0 %v4320_v54  ;;  %2849 = vmatmul.mubr.f32.vlgmr.msra.gmra.mrb[16].mxu1 %v4320_v54 }
 0x7cd   :  { %2883 = vmatprep.mubr.msk.f32.mxu0 %vm3673_vm0, %v3672_v1  ;;  %3392 = vmatpush3.bf16.msra.mxu0 %v3391_v61  ;;  %v2215_v1 = vld [vmem:[#allocation13 + $0x38] sm:$0xff] }
 0x7ce   :  { %3393 = vmatprep.subr.bf16.mxu0 %v3671_v0  ;;  %v3400_v56 = vpack.c.bf16 %v2215_v1, %v2214_v21 }
 0x7d1   :  { %3395 = vmatpush3.bf16.msra.mxu0 %v3394_v9 }
 0x7d2   :  { %3396 = vmatprep.subr.bf16.mxu0 %v3671_v0 }
 0x7d5   :  { %3398 = vmatpush3.bf16.msra.mxu0 %v3397_v14 }
 0x7d6   :  { %3399 = vmatprep.subr.bf16.mxu0 %v3671_v0 }
 0x7d9   :  { %3401 = vmatpush3.bf16.msra.mxu0 %v3400_v56 }
 0x7da   :  { %3402 = vmatprep.subr.bf16.mxu0 %v3671_v0 }
 0x7dd   :  { %3404 = vmatpush3.bf16.msra.mxu0 %v3403_v29 }
 0x7de   :  { %3405 = vmatprep.subr.bf16.mxu0 %v3671_v0 }
 0x7e1   :  { %3407 = vmatpush3.bf16.msra.mxu0 %v3406_v33 }
 0x7e2   :  { %3408 = vmatprep.subr.bf16.mxu0 %v3671_v0 }
 0x7e5   :  { %3410 = vmatpush3.bf16.msra.mxu0 %v3409_v42 }
 0x7e6   :  { %3411 = vmatprep.subr.bf16.mxu0 %v3671_v0  ;;  %v2189_v0 = vrot.slane %v2180_v3, 1 }
 0x7e9   :  { %3413 = vmatpush3.bf16.msra.mxu0 %v3412_v57 }
 0x89f   :  { %v2104_v6 = vpop.f32.mrb[16].mxu0  ;;  %v2175_v15 = vpop.f32.mrb[16].mxu1 }
 0x8a0   :  { %v2105_v16 = vadd.f32 %v2104_v6, %v2026_v4  ;;  %v2106_v22 = vpop.f32.mrb[17].mxu0  ;;  %v2850_v63 = vpop.f32.mrb[17].mxu1  ;;  %v2176_v59 = vadd.f32 %v2175_v15, %v2034_v38 }
 0x8a1   :  { %v2107_v20 = vadd.f32 %v2106_v22, %v2030_v12 }
 0x8a2   :  { %v2181_v8 = vadd.f32 %v2180_v3, %v2105_v16 }
 0x8a3   :  { %v2191_v28 = vadd.f32 %v2189_v0, %v2107_v20 }
 0x8a4   :  { %v2363_v17 = vmul.f32 -1.442695, %v2181_v8 }
 0x8a5   :  { %v2364_v36 = vmul.f32 -1.442695, %v2191_v28 }
 0x8a6   :  { %3498 = vpow2.f32 %v2363_v17 }
 0x8a7   :  { %3500 = vpow2.f32 %v2364_v36 }
 0x8b0   :  { %v3499_v30 = vpop.eup %3498 }
 0x8b1   :  { %v2185_v41 = vadd.f32 1.0, %v3499_v30  ;;  %v3501_v48 = vpop.eup %3500 }
 0x8b2   :  { %v2195_v49 = vadd.f32 1.0, %v3501_v48 }
 0x8b3   :  { %3502 = vrcp.f32 %v2185_v41 }
 0x8bd   :  { %v3503_v7 = vpop.eup %3502 }
 0x8be   :  { %v2198_v13 = vmul.f32 %v3503_v7, %v2176_v59 }
 0x8c0   :  { %v2201_v45 = vadd.f32 %v2199_v25, %v2198_v13 }
 0x8c2   :  { %3504 = vtanh.f32 %v2201_v45 }
 0x8c3   :  { %3506 = vrcp.f32 %v2195_v49 }
 0x8cc   :  { %v3505_v44 = vpop.eup %3504 }
 0x8cd   :  { %v2203_v52 = vsub.f32 %v4320_v54, %v3505_v44  ;;  %v3507_v2 = vpop.eup %3506 }
 0x8cf   :  { %v2204_v5 = vmul.f32 %v3507_v2, %v2203_v52 }
 0x8d1   :  { %v2205_v23 = vadd.f32 %v3505_v44, %v2204_v5 }
 0x8d3   :  { %2206 = vst [vmem:[#allocation4 + $0x7] sm:$0x1] %v2205_v23  ;;  %2302 = vst [vmem:[#allocation16] sm:$0x1] %v2205_v23 }
 0x8da   :  { %v2207_v18 = vld [vmem:[#allocation4] sm:$0xff] }
 0x8db   :  { %2884 = vmatmul.mubr.f32.vlgmr.msra.gmra.mrb[18].mxu0 %v2207_v18 }
 0x8dc   :  { %3617 = shalt.err (!%p3614_p11)
}
 0x8dd   :  { %s3618_s22 = scalar_lea.hbm %s4378_s10, 16 }
 0x8de   :  { %p3619_p12 = scmp.ne.s32.totalorder %s4378_s10, %s3618_s22  ;;  %p3622_p13 = scmp.lt.u32.totalorder %s3618_s22, %s4378_s10 }
 0x8e0   :  { %p3624_p0 = pnand %p3622_p13, %p3619_p12 }
 0x8e2   :  { %3627 = shalt.err (!%p3624_p0)
}
 0x8e3   :  { %2322 = dma.vmem_to_hbm [thread:$0]  %s2320_s19, 16, %s4378_s10, [#allocation17]   ;;  %v2365_v40 = vld [vmem:[%s4376_s8] ss:$0 sm:$0xff] }
 0x8e4   :  { %s3675_s30 = smov [#allocation15]  }
 0x8e5   :  { %s2309_s14 = sshll.u32 %s3675_s30, 4  ;;  %s2310_s14 = int_to_ptr.vmem [resolvable:$true] %s2309_s14 }
 0x8e6   :  { %s3628_s5 = scalar_lea.vmem %s2310_s14, 128  ;;  %p3633_p2 = scmp.lt.s32.totalorder %s2310_s14, %s2310_s14 }
 0x8e7   :  { %p3629_p1 = scmp.ne.s32.totalorder %s2310_s14, %s3628_s5  ;;  %p3634_p3 = scmp.lt.s32.totalorder %s3628_s5, %s3628_s5 }
 0x8e9   :  { %p3635_p4 = por %p3634_p3, %p3633_p2 }
 0x8eb   :  { %p3636_p5 = pnand %p3635_p4, %p3629_p1 }
 0x9ae   :  { %v2297_v19 = vpop.f32.mrb[18].mxu0 }
 0x9af   :  { %v2298_v26 = vadd.f32 %v2365_v40, %v2297_v19  ;;  %v2885_v31 = vpop.f32.mrb[19].mxu0 }
 0x9b1   :  { %2301 = vst [vmem:[#allocation15] sm:$0xff] %v2298_v26 }
 0x9b2   :  { %3639 = shalt.err (!%p3636_p5)
}
 0x9b3   :  { %s3640_s7 = scalar_lea.hbm %s4377_s9, 128 }
 0x9b4   :  { %p3641_p6 = scmp.ne.s32.totalorder %s4377_s9, %s3640_s7  ;;  %p3644_p7 = scmp.lt.u32.totalorder %s3640_s7, %s4377_s9 }
 0x9b6   :  { %p3646_p8 = pnand %p3644_p7, %p3641_p6 }
 0x9b8   :  { %3649 = shalt.err (!%p3646_p8)
}
 0x9b9   :  { %2312 = dma.vmem_to_hbm [thread:$0]  %s2310_s14, 128, %s4377_s9, [#allocation9]  }
 0x9ba   :  { %3658 = dma.done.wait [#allocation9], 128  }
 0x9bb   :  { %3659 = vsyncadd [#allocation9], 4294967168 }
 0x9bc   :  { %3660 = dma.done.wait [#allocation17], 16  }
 0x9bd   :  { %3661 = vsyncadd [#allocation17], 4294967280 }
 0x9be   :  { %2329 = vsyncpa [#allocation8], 1 }
 0x9bf   :  { %2330 = vsyncpa [#allocation11], 1 }
 0x9c0   :  { %2331 = vsyncpa [#allocation14], 1 }
 0x9c1   :  { %2332 = vsyncpa [#allocation9], 1 }
 0x9c2   :  { %2333 = vsyncpa [#allocation17], 1 }

</bundles_post_ra>
